<compile_context>
chip_gen: v7x
topology: tpu7x:2x2x1
jax: 0.10.0
libtpu: 0.0.40
codegen_flags: <defaults>
</compile_context>

<pallas_src>
import jax
import jax.numpy as jnp
from jax.experimental import pallas as pl
from jax.experimental.pallas import tpu as pltpu


def egnn_layer_kernel(
    # tiled edge data
    row_sub_ref, col_sub_ref, row_lane_ref, edge_attr_ref,
    # resident node data
    x_ref, pos_ref,
    # edge_mlp params (first Linear split into its concat segments)
    ew1_xr_ref, ew1_xc_ref, ew1_ea_ref, eb1_ref, ew2_ref, eb2_ref,
    # node_mlp params (first Linear split into its concat segments)
    nw1_x_ref, nw1_ag_ref, nb1_ref, nw2_ref, nb2_ref,
    # coord_mlp params (cw1 transposed to [1,H]; cb1/cw2/cb2 as SMEM scalars)
    cw1t_ref, cb1_ref, cw2_ref, cb2_ref,
    # outputs
    node_feat_ref, pos_out_ref,
    # scratch accumulators
    xw_r_sc, xw_c_sc, agg_sc, csum_sc,
):
    f32 = jnp.float32
    k = pl.program_id(0)
    TE = row_sub_ref.shape[0]
    N = x_ref.shape[0]

    # ---- init: zero accumulators, hoist x @ W1-segments (edge MLP prefuse) ----
    @pl.when(k == 0)
    def _init():
        x = x_ref[...]
        xw_r_sc[...] = jnp.dot(x, ew1_xr_ref[...], preferred_element_type=f32)
        xw_c_sc[...] = jnp.dot(x, ew1_xc_ref[...], preferred_element_type=f32)
        agg_sc[...] = jnp.zeros_like(agg_sc)
        csum_sc[...] = jnp.zeros_like(csum_sc)

    # ---- build per-tile one-hots from the edge indices ----
    # Padded edges carry sentinel index N (matches no node id in [0, N)), so
    # their one-hot rows are all zero and they drop out of every reduction.
    node_iota_lane = jax.lax.broadcasted_iota(jnp.int32, (TE, N), 1)
    oh_row = jnp.where(row_sub_ref[...] == node_iota_lane, 1.0, 0.0)   # [TE, N]
    oh_col = jnp.where(col_sub_ref[...] == node_iota_lane, 1.0, 0.0)   # [TE, N]

    # ---- edge MLP: gather + Linear(2F+5, H) fused as one-hot @ (x @ W1seg) ----
    h = (jnp.dot(oh_row, xw_r_sc[...], preferred_element_type=f32)
         + jnp.dot(oh_col, xw_c_sc[...], preferred_element_type=f32)
         + jnp.dot(edge_attr_ref[...], ew1_ea_ref[...], preferred_element_type=f32)
         + eb1_ref[...])
    h = jnp.maximum(h, 0.0)
    edge_feat = jnp.dot(h, ew2_ref[...], preferred_element_type=f32) + eb2_ref[...]

    # ---- LomaSumAggr: scatter-sum by `row` via in-kernel one-hot matmul ----
    node_iota_sub = jax.lax.broadcasted_iota(jnp.int32, (N, TE), 0)
    scatter_oh = jnp.where(node_iota_sub == row_lane_ref[...], 1.0, 0.0)  # [N, TE]
    agg_sc[...] += jnp.dot(scatter_oh, edge_feat, preferred_element_type=f32)

    # ---- coord gate on the VPU (avoid a 1-lane MXU pass); scalars from SMEM ----
    c = jnp.sum(edge_feat * cw1t_ref[...], axis=-1, keepdims=True) + cb1_ref[0, 0]
    c = jnp.maximum(c, 0.0)
    c = c * cw2_ref[0, 0] + cb2_ref[0, 0]                                 # [TE, 1]

    # relative positions via one matmul: (oh_row - oh_col) @ pos
    rel = jnp.dot(oh_row - oh_col, pos_ref[...], preferred_element_type=f32)  # [TE, D]
    csum_sc[...] += jnp.sum(c * rel, axis=0, keepdims=True)               # [1, D]

    # ---- finalize: node MLP + broadcast position update (once, last step) ----
    @pl.when(k == pl.num_programs(0) - 1)
    def _finalize():
        x = x_ref[...]
        h2 = (jnp.dot(x, nw1_x_ref[...], preferred_element_type=f32)
              + jnp.dot(agg_sc[...], nw1_ag_ref[...], preferred_element_type=f32)
              + nb1_ref[...])
        h2 = jnp.maximum(h2, 0.0)
        node_feat_ref[...] = (jnp.dot(h2, nw2_ref[...], preferred_element_type=f32)
                              + nb2_ref[...]).astype(node_feat_ref.dtype)
        pos_out_ref[...] = (pos_ref[...] + csum_sc[...]).astype(pos_out_ref.dtype)


def egnn_layer(x, edge_index, edge_attr, pos, params, *, e_tile=128):
    N, F = x.shape
    H = params["eb1"].shape[-1]
    D = pos.shape[1]
    E, A = edge_attr.shape
    row = edge_index[0].astype(jnp.int32)
    col = edge_index[1].astype(jnp.int32)

    # Pad E up to a multiple of the edge tile. Padded edges get sentinel node
    # index N (-> all-zero one-hots inside the kernel) and zero edge_attr.
    e_pad = max(e_tile, ((E + e_tile - 1) // e_tile) * e_tile)
    pad = e_pad - E
    row_p = jnp.concatenate([row, jnp.full((pad,), N, jnp.int32)])
    col_p = jnp.concatenate([col, jnp.full((pad,), N, jnp.int32)])
    ea_p = jnp.concatenate([edge_attr, jnp.zeros((pad, A), edge_attr.dtype)], axis=0)

    row_sub = row_p.reshape(e_pad, 1)     # sublane-oriented (gather one-hots)
    col_sub = col_p.reshape(e_pad, 1)
    row_lane = row_p.reshape(1, e_pad)    # lane-oriented (scatter one-hot)

    # Split the first Linear of each MLP along its input axis (concat segments).
    ew1 = params["ew1"]
    ew1_xr, ew1_xc, ew1_ea = ew1[:F], ew1[F:2 * F], ew1[2 * F:]
    nw1 = params["nw1"]
    nw1_x, nw1_ag = nw1[:F], nw1[F:]
    cw1_t = params["cw1"].reshape(1, H)
    cb1_s = params["cb1"].reshape(1, 1)
    cw2_s = params["cw2"].reshape(1, 1)
    cb2_s = params["cb2"].reshape(1, 1)

    num_e = e_pad // e_tile

    full = lambda shape: pl.BlockSpec(shape, lambda k: (0, 0))
    smem = pl.BlockSpec(memory_space=pltpu.MemorySpace.SMEM)

    grid_spec = pltpu.PrefetchScalarGridSpec(
        num_scalar_prefetch=0,
        grid=(num_e,),
        in_specs=[
            pl.BlockSpec((e_tile, 1), lambda k: (k, 0)),   # row_sub  [E,1]
            pl.BlockSpec((e_tile, 1), lambda k: (k, 0)),   # col_sub  [E,1]
            pl.BlockSpec((1, e_tile), lambda k: (0, k)),   # row_lane [1,E]
            pl.BlockSpec((e_tile, A), lambda k: (k, 0)),   # edge_attr
            full((N, F)),                                  # x (resident)
            full((N, D)),                                  # pos (resident)
            full((F, H)), full((F, H)), full((A, H)), full((1, H)),   # edge mlp 1
            full((H, H)), full((1, H)),                                # edge mlp 2
            full((F, H)), full((H, H)), full((1, H)),                  # node mlp 1
            full((H, H)), full((1, H)),                                # node mlp 2
            full((1, H)),                                              # cw1^T
            smem, smem, smem,                                          # cb1, cw2, cb2
        ],
        out_specs=[full((N, H)), full((N, D))],
        scratch_shapes=[
            pltpu.VMEM((N, H), jnp.float32),   # x @ ew1[:F]
            pltpu.VMEM((N, H), jnp.float32),   # x @ ew1[F:2F]
            pltpu.VMEM((N, H), jnp.float32),   # agg accumulator
            pltpu.VMEM((1, D), jnp.float32),   # global coord-sum accumulator
        ],
    )

    node_feat, pos_out = pl.pallas_call(
        egnn_layer_kernel,
        grid_spec=grid_spec,
        out_shape=(jax.ShapeDtypeStruct((N, H), x.dtype),
                   jax.ShapeDtypeStruct((N, D), pos.dtype)),
        compiler_params=pltpu.CompilerParams(
            dimension_semantics=("arbitrary",)),   # E is a reduction axis
    )(row_sub, col_sub, row_lane, ea_p, x, pos,
      ew1_xr, ew1_xc, ew1_ea, params["eb1"], params["ew2"], params["eb2"],
      nw1_x, nw1_ag, params["nb1"], params["nw2"], params["nb2"],
      cw1_t, cb1_s, cw2_s, cb2_s)
    return node_feat, pos_out


def egnn_layer_ref(x, edge_index, edge_attr, pos, params):
    """Pure-JAX reference of the PyTorch forward (for validation)."""
    row, col = edge_index[0], edge_index[1]
    relu = lambda v: jnp.maximum(v, 0.0)
    edge_input = jnp.concatenate([x[row], x[col], edge_attr], axis=1)
    h = relu(edge_input @ params["ew1"] + params["eb1"])
    edge_feat = h @ params["ew2"] + params["eb2"]
    agg = jnp.zeros((x.shape[0], edge_feat.shape[1]), x.dtype).at[row].add(edge_feat)
    node_input = jnp.concatenate([x, agg], axis=1)
    h2 = relu(node_input @ params["nw1"] + params["nb1"])
    node_feat = h2 @ params["nw2"] + params["nb2"]
    rel = pos[row] - pos[col]
    c = relu(edge_feat @ params["cw1"] + params["cb1"])
    c = c @ params["cw2"] + params["cb2"]
    coord_upd = jnp.sum(c * rel, axis=0, keepdims=True)
    return node_feat, pos + coord_upd


if __name__ == "__main__":
    key = jax.random.PRNGKey(0)
    # nodes, edges, in_features, out_features, pos dim
    N, E, F, H, D = 16, 300, 8, 32, 3   # E=300 -> 3 edge tiles of 128 (84 padded)
    keys = jax.random.split(key, 12)

    x = jax.random.normal(keys[0], (N, F), jnp.float32)
    pos = jax.random.normal(keys[1], (N, D), jnp.float32)
    edge_attr = jax.random.normal(keys[2], (E, 5), jnp.float32)
    row = jax.random.randint(keys[3], (E,), 0, N)
    col = jax.random.randint(keys[4], (E,), 0, N)
    edge_index = jnp.stack([row, col])

    def lin_init(k, fan_in, fan_out):
        kw, kb = jax.random.split(k)
        bound = 1.0 / (fan_in ** 0.5)
        w = jax.random.uniform(kw, (fan_in, fan_out), jnp.float32, -bound, bound)
        b = jax.random.uniform(kb, (1, fan_out), jnp.float32, -bound, bound)
        return w, b

    ew1, eb1 = lin_init(keys[5], 2 * F + 5, H)
    ew2, eb2 = lin_init(keys[6], H, H)
    nw1, nb1 = lin_init(keys[7], F + H, H)
    nw2, nb2 = lin_init(keys[8], H, H)
    cw1, cb1 = lin_init(keys[9], H, 1)
    cw2, cb2 = lin_init(keys[10], 1, 1)
    params = dict(ew1=ew1, eb1=eb1, ew2=ew2, eb2=eb2,
                  nw1=nw1, nb1=nb1, nw2=nw2, nb2=nb2,
                  cw1=cw1, cb1=cb1, cw2=cw2, cb2=cb2)

    node_feat, pos_out = egnn_layer(x, edge_index, edge_attr, pos, params)
    jax.block_until_ready((node_feat, pos_out))

    nf_ref, pos_ref_out = egnn_layer_ref(x, edge_index, edge_attr, pos, params)
    # Tiled accumulation + prefused concat matmuls change FP summation order
    # slightly vs the reference; keep a modest tolerance.
    assert jnp.allclose(node_feat, nf_ref, atol=2e-3, rtol=2e-3)
    assert jnp.allclose(pos_out, pos_ref_out, atol=2e-3, rtol=2e-3)

    print("KERNEL_OK")
</pallas_src>

<mosaic_0001>
module attributes {stable_mosaic.version = 11 : i64} {
  func.func @egnn_layer_kernel(%arg0: i32, %arg1: memref<128x1xi32, #tpu.memory_space<vmem>>, %arg2: memref<128x1xi32, #tpu.memory_space<vmem>>, %arg3: memref<1x128xi32, #tpu.memory_space<vmem>>, %arg4: memref<128x5xf32, #tpu.memory_space<vmem>>, %arg5: memref<16x8xf32, #tpu.memory_space<vmem>>, %arg6: memref<16x3xf32, #tpu.memory_space<vmem>>, %arg7: memref<8x32xf32, #tpu.memory_space<vmem>>, %arg8: memref<8x32xf32, #tpu.memory_space<vmem>>, %arg9: memref<5x32xf32, #tpu.memory_space<vmem>>, %arg10: memref<1x32xf32, #tpu.memory_space<vmem>>, %arg11: memref<32x32xf32, #tpu.memory_space<vmem>>, %arg12: memref<1x32xf32, #tpu.memory_space<vmem>>, %arg13: memref<8x32xf32, #tpu.memory_space<vmem>>, %arg14: memref<32x32xf32, #tpu.memory_space<vmem>>, %arg15: memref<1x32xf32, #tpu.memory_space<vmem>>, %arg16: memref<32x32xf32, #tpu.memory_space<vmem>>, %arg17: memref<1x32xf32, #tpu.memory_space<vmem>>, %arg18: memref<1x32xf32, #tpu.memory_space<vmem>>, %arg19: memref<1x1xf32, #tpu.memory_space<smem>>, %arg20: memref<1x1xf32, #tpu.memory_space<smem>>, %arg21: memref<1x1xf32, #tpu.memory_space<smem>>, %arg22: memref<16x32xf32, #tpu.memory_space<vmem>>, %arg23: memref<16x3xf32, #tpu.memory_space<vmem>>, %arg24: memref<16x32xf32, #tpu.memory_space<vmem>>, %arg25: memref<16x32xf32, #tpu.memory_space<vmem>>, %arg26: memref<16x32xf32, #tpu.memory_space<vmem>>, %arg27: memref<1x3xf32, #tpu.memory_space<vmem>>) attributes {dimension_semantics = [#tpu.dimension_semantics<arbitrary>], iteration_bounds = array<i64: 3>, scalar_prefetch = 0 : i64, scratch_operands = 4 : i64, tpu.core_type = #tpu.core_type<tc>, window_params = [{transform_indices = @transform_0, window_bounds = array<i64: 128, 1>}, {transform_indices = @transform_1, window_bounds = array<i64: 128, 1>}, {transform_indices = @transform_2, window_bounds = array<i64: 1, 128>}, {transform_indices = @transform_3, window_bounds = array<i64: 128, 5>}, {pipeline_mode = #tpu.pipeline_mode<synchronous>, transform_indices = @transform_4, window_bounds = array<i64: 16, 8>}, {pipeline_mode = #tpu.pipeline_mode<synchronous>, transform_indices = @transform_5, window_bounds = array<i64: 16, 3>}, {pipeline_mode = #tpu.pipeline_mode<synchronous>, transform_indices = @transform_6, window_bounds = array<i64: 8, 32>}, {pipeline_mode = #tpu.pipeline_mode<synchronous>, transform_indices = @transform_7, window_bounds = array<i64: 8, 32>}, {pipeline_mode = #tpu.pipeline_mode<synchronous>, transform_indices = @transform_8, window_bounds = array<i64: 5, 32>}, {pipeline_mode = #tpu.pipeline_mode<synchronous>, transform_indices = @transform_9, window_bounds = array<i64: 1, 32>}, {pipeline_mode = #tpu.pipeline_mode<synchronous>, transform_indices = @transform_10, window_bounds = array<i64: 32, 32>}, {pipeline_mode = #tpu.pipeline_mode<synchronous>, transform_indices = @transform_11, window_bounds = array<i64: 1, 32>}, {pipeline_mode = #tpu.pipeline_mode<synchronous>, transform_indices = @transform_12, window_bounds = array<i64: 8, 32>}, {pipeline_mode = #tpu.pipeline_mode<synchronous>, transform_indices = @transform_13, window_bounds = array<i64: 32, 32>}, {pipeline_mode = #tpu.pipeline_mode<synchronous>, transform_indices = @transform_14, window_bounds = array<i64: 1, 32>}, {pipeline_mode = #tpu.pipeline_mode<synchronous>, transform_indices = @transform_15, window_bounds = array<i64: 32, 32>}, {pipeline_mode = #tpu.pipeline_mode<synchronous>, transform_indices = @transform_16, window_bounds = array<i64: 1, 32>}, {pipeline_mode = #tpu.pipeline_mode<synchronous>, transform_indices = @transform_17, window_bounds = array<i64: 1, 32>}, {transform_indices = @transform_18, window_bounds = array<i64: 1, 1>}, {transform_indices = @transform_19, window_bounds = array<i64: 1, 1>}, {transform_indices = @transform_20, window_bounds = array<i64: 1, 1>}, {pipeline_mode = #tpu.pipeline_mode<synchronous>, transform_indices = @transform_21, window_bounds = array<i64: 16, 32>}, {pipeline_mode = #tpu.pipeline_mode<synchronous>, transform_indices = @transform_22, window_bounds = array<i64: 16, 3>}]} {
    %c0_i32 = arith.constant 0 : i32
    %0 = arith.cmpi eq, %arg0, %c0_i32 : i32
    %1 = arith.extui %0 : i1 to i32
    %c0_i32_0 = arith.constant 0 : i32
    %2 = arith.cmpi ne, %1, %c0_i32_0 : i32
    scf.if %2 {
      %c0_54 = arith.constant 0 : index
      %c0_55 = arith.constant 0 : index
      %75 = vector.load %arg5[%c0_54, %c0_55] : memref<16x8xf32, #tpu.memory_space<vmem>>, vector<16x8xf32>
      %c0_56 = arith.constant 0 : index
      %c0_57 = arith.constant 0 : index
      %76 = vector.load %arg7[%c0_56, %c0_57] : memref<8x32xf32, #tpu.memory_space<vmem>>, vector<8x32xf32>
      %cst_58 = arith.constant dense<0.000000e+00> : vector<16x32xf32>
      %77 = tpu.matmul %75, %76, %cst_58 {dimension_numbers = #tpu.dot_dimension_numbers<[1], [0], [0], [1], [0, 0, 1, 1], [], []>} : vector<16x8xf32>, vector<8x32xf32>, vector<16x32xf32> -> vector<16x32xf32>
      %c0_59 = arith.constant 0 : index
      %c0_60 = arith.constant 0 : index
      %78 = vector.load %arg24[%c0_59, %c0_60] : memref<16x32xf32, #tpu.memory_space<vmem>>, vector<16x32xf32>
      tpu.vector_store %arg24[%c0_59, %c0_60], %77 {strides = array<i32>} : memref<16x32xf32, #tpu.memory_space<vmem>>, vector<16x32xf32>,
      %c0_61 = arith.constant 0 : index
      %c0_62 = arith.constant 0 : index
      %79 = vector.load %arg8[%c0_61, %c0_62] : memref<8x32xf32, #tpu.memory_space<vmem>>, vector<8x32xf32>
      %cst_63 = arith.constant dense<0.000000e+00> : vector<16x32xf32>
      %80 = tpu.matmul %75, %79, %cst_63 {dimension_numbers = #tpu.dot_dimension_numbers<[1], [0], [0], [1], [0, 0, 1, 1], [], []>} : vector<16x8xf32>, vector<8x32xf32>, vector<16x32xf32> -> vector<16x32xf32>
      %c0_64 = arith.constant 0 : index
      %c0_65 = arith.constant 0 : index
      %81 = vector.load %arg25[%c0_64, %c0_65] : memref<16x32xf32, #tpu.memory_space<vmem>>, vector<16x32xf32>
      tpu.vector_store %arg25[%c0_64, %c0_65], %80 {strides = array<i32>} : memref<16x32xf32, #tpu.memory_space<vmem>>, vector<16x32xf32>,
      %cst_66 = arith.constant 0.000000e+00 : f32
      %82 = vector.broadcast %cst_66 : f32 to vector<16x32xf32>
      %c0_67 = arith.constant 0 : index
      %c0_68 = arith.constant 0 : index
      %83 = vector.load %arg26[%c0_67, %c0_68] : memref<16x32xf32, #tpu.memory_space<vmem>>, vector<16x32xf32>
      tpu.vector_store %arg26[%c0_67, %c0_68], %82 {strides = array<i32>} : memref<16x32xf32, #tpu.memory_space<vmem>>, vector<16x32xf32>,
      %cst_69 = arith.constant 0.000000e+00 : f32
      %84 = vector.broadcast %cst_69 : f32 to vector<1x3xf32>
      %c0_70 = arith.constant 0 : index
      %c0_71 = arith.constant 0 : index
      %85 = vector.load %arg27[%c0_70, %c0_71] : memref<1x3xf32, #tpu.memory_space<vmem>>, vector<1x3xf32>
      tpu.vector_store %arg27[%c0_70, %c0_71], %84 {strides = array<i32>} : memref<1x3xf32, #tpu.memory_space<vmem>>, vector<1x3xf32>,
    } else {
    }
    %3 = tpu.iota {dimensions = array<i32: 1>} : vector<128x16xi32>
    %c0 = arith.constant 0 : index
    %c0_1 = arith.constant 0 : index
    %4 = vector.load %arg1[%c0, %c0_1] : memref<128x1xi32, #tpu.memory_space<vmem>>, vector<128x1xi32>
    %5 = vector.broadcast %4 : vector<128x1xi32> to vector<128x16xi32>
    %6 = arith.cmpi eq, %5, %3 : vector<128x16xi32>
    %cst = arith.constant 1.000000e+00 : f32
    %cst_2 = arith.constant 0.000000e+00 : f32
    %7 = vector.broadcast %cst : f32 to vector<128x16xf32>
    %8 = vector.broadcast %cst_2 : f32 to vector<128x16xf32>
    %9 = arith.select %6, %7, %8 : vector<128x16xi1>, vector<128x16xf32>
    %c0_3 = arith.constant 0 : index
    %c0_4 = arith.constant 0 : index
    %10 = vector.load %arg2[%c0_3, %c0_4] : memref<128x1xi32, #tpu.memory_space<vmem>>, vector<128x1xi32>
    %11 = vector.broadcast %10 : vector<128x1xi32> to vector<128x16xi32>
    %12 = arith.cmpi eq, %11, %3 : vector<128x16xi32>
    %cst_5 = arith.constant 1.000000e+00 : f32
    %cst_6 = arith.constant 0.000000e+00 : f32
    %13 = vector.broadcast %cst_5 : f32 to vector<128x16xf32>
    %14 = vector.broadcast %cst_6 : f32 to vector<128x16xf32>
    %15 = arith.select %12, %13, %14 : vector<128x16xi1>, vector<128x16xf32>
    %c0_7 = arith.constant 0 : index
    %c0_8 = arith.constant 0 : index
    %16 = vector.load %arg24[%c0_7, %c0_8] : memref<16x32xf32, #tpu.memory_space<vmem>>, vector<16x32xf32>
    %cst_9 = arith.constant dense<0.000000e+00> : vector<128x32xf32>
    %17 = tpu.matmul %9, %16, %cst_9 {dimension_numbers = #tpu.dot_dimension_numbers<[1], [0], [0], [1], [0, 0, 1, 1], [], []>} : vector<128x16xf32>, vector<16x32xf32>, vector<128x32xf32> -> vector<128x32xf32>
    %c0_10 = arith.constant 0 : index
    %c0_11 = arith.constant 0 : index
    %18 = vector.load %arg25[%c0_10, %c0_11] : memref<16x32xf32, #tpu.memory_space<vmem>>, vector<16x32xf32>
    %cst_12 = arith.constant dense<0.000000e+00> : vector<128x32xf32>
    %19 = tpu.matmul %15, %18, %cst_12 {dimension_numbers = #tpu.dot_dimension_numbers<[1], [0], [0], [1], [0, 0, 1, 1], [], []>} : vector<128x16xf32>, vector<16x32xf32>, vector<128x32xf32> -> vector<128x32xf32>
    %20 = arith.addf %17, %19 : vector<128x32xf32>
    %c0_13 = arith.constant 0 : index
    %c0_14 = arith.constant 0 : index
    %21 = vector.load %arg4[%c0_13, %c0_14] : memref<128x5xf32, #tpu.memory_space<vmem>>, vector<128x5xf32>
    %c0_15 = arith.constant 0 : index
    %c0_16 = arith.constant 0 : index
    %22 = vector.load %arg9[%c0_15, %c0_16] : memref<5x32xf32, #tpu.memory_space<vmem>>, vector<5x32xf32>
    %cst_17 = arith.constant dense<0.000000e+00> : vector<128x32xf32>
    %23 = tpu.matmul %21, %22, %cst_17 {dimension_numbers = #tpu.dot_dimension_numbers<[1], [0], [0], [1], [0, 0, 1, 1], [], []>} : vector<128x5xf32>, vector<5x32xf32>, vector<128x32xf32> -> vector<128x32xf32>
    %24 = arith.addf %20, %23 : vector<128x32xf32>
    %c0_18 = arith.constant 0 : index
    %c0_19 = arith.constant 0 : index
    %25 = vector.load %arg10[%c0_18, %c0_19] : memref<1x32xf32, #tpu.memory_space<vmem>>, vector<1x32xf32>
    %26 = vector.broadcast %25 : vector<1x32xf32> to vector<128x32xf32>
    %27 = arith.addf %24, %26 : vector<128x32xf32>
    %cst_20 = arith.constant 0.000000e+00 : f32
    %28 = vector.broadcast %cst_20 : f32 to vector<128x32xf32>
    %29 = arith.maximumf %27, %28 : vector<128x32xf32>
    %c0_21 = arith.constant 0 : index
    %c0_22 = arith.constant 0 : index
    %30 = vector.load %arg11[%c0_21, %c0_22] : memref<32x32xf32, #tpu.memory_space<vmem>>, vector<32x32xf32>
    %cst_23 = arith.constant dense<0.000000e+00> : vector<128x32xf32>
    %31 = tpu.matmul %29, %30, %cst_23 {dimension_numbers = #tpu.dot_dimension_numbers<[1], [0], [0], [1], [0, 0, 1, 1], [], []>} : vector<128x32xf32>, vector<32x32xf32>, vector<128x32xf32> -> vector<128x32xf32>
    %c0_24 = arith.constant 0 : index
    %c0_25 = arith.constant 0 : index
    %32 = vector.load %arg12[%c0_24, %c0_25] : memref<1x32xf32, #tpu.memory_space<vmem>>, vector<1x32xf32>
    %33 = vector.broadcast %32 : vector<1x32xf32> to vector<128x32xf32>
    %34 = arith.addf %31, %33 : vector<128x32xf32>
    %35 = tpu.iota {dimensions = array<i32: 0>} : vector<16x128xi32>
    %c0_26 = arith.constant 0 : index
    %c0_27 = arith.constant 0 : index
    %36 = vector.load %arg3[%c0_26, %c0_27] : memref<1x128xi32, #tpu.memory_space<vmem>>, vector<1x128xi32>
    %37 = vector.broadcast %36 : vector<1x128xi32> to vector<16x128xi32>
    %38 = arith.cmpi eq, %35, %37 : vector<16x128xi32>
    %cst_28 = arith.constant 1.000000e+00 : f32
    %cst_29 = arith.constant 0.000000e+00 : f32
    %39 = vector.broadcast %cst_28 : f32 to vector<16x128xf32>
    %40 = vector.broadcast %cst_29 : f32 to vector<16x128xf32>
    %41 = arith.select %38, %39, %40 : vector<16x128xi1>, vector<16x128xf32>
    %c0_30 = arith.constant 0 : index
    %c0_31 = arith.constant 0 : index
    %42 = vector.load %arg26[%c0_30, %c0_31] : memref<16x32xf32, #tpu.memory_space<vmem>>, vector<16x32xf32>
    %cst_32 = arith.constant dense<0.000000e+00> : vector<16x32xf32>
    %43 = tpu.matmul %41, %34, %cst_32 {dimension_numbers = #tpu.dot_dimension_numbers<[1], [0], [0], [1], [0, 0, 1, 1], [], []>} : vector<16x128xf32>, vector<128x32xf32>, vector<16x32xf32> -> vector<16x32xf32>
    %44 = arith.addf %42, %43 : vector<16x32xf32>
    %c0_33 = arith.constant 0 : index
    %c0_34 = arith.constant 0 : index
    %45 = vector.load %arg26[%c0_33, %c0_34] : memref<16x32xf32, #tpu.memory_space<vmem>>, vector<16x32xf32>
    tpu.vector_store %arg26[%c0_33, %c0_34], %44 {strides = array<i32>} : memref<16x32xf32, #tpu.memory_space<vmem>>, vector<16x32xf32>,
    %c0_35 = arith.constant 0 : index
    %c0_36 = arith.constant 0 : index
    %46 = vector.load %arg18[%c0_35, %c0_36] : memref<1x32xf32, #tpu.memory_space<vmem>>, vector<1x32xf32>
    %47 = vector.broadcast %46 : vector<1x32xf32> to vector<128x32xf32>
    %48 = arith.mulf %34, %47 : vector<128x32xf32>
    %cst_37 = arith.constant dense<0.000000e+00> : vector<128xf32>
    %49 = vector.multi_reduction <add>, %48, %cst_37 [1] : vector<128x32xf32> to vector<128xf32>
    %50 = vector.shape_cast %49 : vector<128xf32> to vector<128x1xf32>
    %c0_38 = arith.constant 0 : index
    %c0_39 = arith.constant 0 : index
    %51 = memref.load %arg19[%c0_38, %c0_39] : memref<1x1xf32, #tpu.memory_space<smem>>
    %52 = vector.broadcast %51 : f32 to vector<128x1xf32>
    %53 = arith.addf %50, %52 : vector<128x1xf32>
    %cst_40 = arith.constant 0.000000e+00 : f32
    %54 = vector.broadcast %cst_40 : f32 to vector<128x1xf32>
    %55 = arith.maximumf %53, %54 : vector<128x1xf32>
    %c0_41 = arith.constant 0 : index
    %c0_42 = arith.constant 0 : index
    %56 = memref.load %arg20[%c0_41, %c0_42] : memref<1x1xf32, #tpu.memory_space<smem>>
    %57 = vector.broadcast %56 : f32 to vector<128x1xf32>
    %58 = arith.mulf %55, %57 : vector<128x1xf32>
    %c0_43 = arith.constant 0 : index
    %c0_44 = arith.constant 0 : index
    %59 = memref.load %arg21[%c0_43, %c0_44] : memref<1x1xf32, #tpu.memory_space<smem>>
    %60 = vector.broadcast %59 : f32 to vector<128x1xf32>
    %61 = arith.addf %58, %60 : vector<128x1xf32>
    %62 = arith.subf %9, %15 : vector<128x16xf32>
    %c0_45 = arith.constant 0 : index
    %c0_46 = arith.constant 0 : index
    %63 = vector.load %arg6[%c0_45, %c0_46] : memref<16x3xf32, #tpu.memory_space<vmem>>, vector<16x3xf32>
    %cst_47 = arith.constant dense<0.000000e+00> : vector<128x3xf32>
    %64 = tpu.matmul %62, %63, %cst_47 {dimension_numbers = #tpu.dot_dimension_numbers<[1], [0], [0], [1], [0, 0, 1, 1], [], []>} : vector<128x16xf32>, vector<16x3xf32>, vector<128x3xf32> -> vector<128x3xf32>
    %c0_48 = arith.constant 0 : index
    %c0_49 = arith.constant 0 : index
    %65 = vector.load %arg27[%c0_48, %c0_49] : memref<1x3xf32, #tpu.memory_space<vmem>>, vector<1x3xf32>
    %66 = vector.broadcast %61 : vector<128x1xf32> to vector<128x3xf32>
    %67 = arith.mulf %66, %64 : vector<128x3xf32>
    %cst_50 = arith.constant dense<0.000000e+00> : vector<3xf32>
    %68 = vector.multi_reduction <add>, %67, %cst_50 [0] : vector<128x3xf32> to vector<3xf32>
    %69 = vector.shape_cast %68 : vector<3xf32> to vector<1x3xf32>
    %70 = arith.addf %65, %69 : vector<1x3xf32>
    %c0_51 = arith.constant 0 : index
    %c0_52 = arith.constant 0 : index
    %71 = vector.load %arg27[%c0_51, %c0_52] : memref<1x3xf32, #tpu.memory_space<vmem>>, vector<1x3xf32>
    tpu.vector_store %arg27[%c0_51, %c0_52], %70 {strides = array<i32>} : memref<1x3xf32, #tpu.memory_space<vmem>>, vector<1x3xf32>,
    %c2_i32 = arith.constant 2 : i32
    %72 = arith.cmpi eq, %arg0, %c2_i32 : i32
    %73 = arith.extui %72 : i1 to i32
    %c0_i32_53 = arith.constant 0 : i32
    %74 = arith.cmpi ne, %73, %c0_i32_53 : i32
    scf.if %74 {
      %c0_54 = arith.constant 0 : index
      %c0_55 = arith.constant 0 : index
      %75 = vector.load %arg5[%c0_54, %c0_55] : memref<16x8xf32, #tpu.memory_space<vmem>>, vector<16x8xf32>
      %c0_56 = arith.constant 0 : index
      %c0_57 = arith.constant 0 : index
      %76 = vector.load %arg13[%c0_56, %c0_57] : memref<8x32xf32, #tpu.memory_space<vmem>>, vector<8x32xf32>
      %cst_58 = arith.constant dense<0.000000e+00> : vector<16x32xf32>
      %77 = tpu.matmul %75, %76, %cst_58 {dimension_numbers = #tpu.dot_dimension_numbers<[1], [0], [0], [1], [0, 0, 1, 1], [], []>} : vector<16x8xf32>, vector<8x32xf32>, vector<16x32xf32> -> vector<16x32xf32>
      %c0_59 = arith.constant 0 : index
      %c0_60 = arith.constant 0 : index
      %78 = vector.load %arg26[%c0_59, %c0_60] : memref<16x32xf32, #tpu.memory_space<vmem>>, vector<16x32xf32>
      %c0_61 = arith.constant 0 : index
      %c0_62 = arith.constant 0 : index
      %79 = vector.load %arg14[%c0_61, %c0_62] : memref<32x32xf32, #tpu.memory_space<vmem>>, vector<32x32xf32>
      %cst_63 = arith.constant dense<0.000000e+00> : vector<16x32xf32>
      %80 = tpu.matmul %78, %79, %cst_63 {dimension_numbers = #tpu.dot_dimension_numbers<[1], [0], [0], [1], [0, 0, 1, 1], [], []>} : vector<16x32xf32>, vector<32x32xf32>, vector<16x32xf32> -> vector<16x32xf32>
      %81 = arith.addf %77, %80 : vector<16x32xf32>
      %c0_64 = arith.constant 0 : index
      %c0_65 = arith.constant 0 : index
      %82 = vector.load %arg15[%c0_64, %c0_65] : memref<1x32xf32, #tpu.memory_space<vmem>>, vector<1x32xf32>
      %83 = vector.broadcast %82 : vector<1x32xf32> to vector<16x32xf32>
      %84 = arith.addf %81, %83 : vector<16x32xf32>
      %cst_66 = arith.constant 0.000000e+00 : f32
      %85 = vector.broadcast %cst_66 : f32 to vector<16x32xf32>
      %86 = arith.maximumf %84, %85 : vector<16x32xf32>
      %c0_67 = arith.constant 0 : index
      %c0_68 = arith.constant 0 : index
      %87 = vector.load %arg16[%c0_67, %c0_68] : memref<32x32xf32, #tpu.memory_space<vmem>>, vector<32x32xf32>
      %cst_69 = arith.constant dense<0.000000e+00> : vector<16x32xf32>
      %88 = tpu.matmul %86, %87, %cst_69 {dimension_numbers = #tpu.dot_dimension_numbers<[1], [0], [0], [1], [0, 0, 1, 1], [], []>} : vector<16x32xf32>, vector<32x32xf32>, vector<16x32xf32> -> vector<16x32xf32>
      %c0_70 = arith.constant 0 : index
      %c0_71 = arith.constant 0 : index
      %89 = vector.load %arg17[%c0_70, %c0_71] : memref<1x32xf32, #tpu.memory_space<vmem>>, vector<1x32xf32>
      %90 = vector.broadcast %89 : vector<1x32xf32> to vector<16x32xf32>
      %91 = arith.addf %88, %90 : vector<16x32xf32>
      %c0_72 = arith.constant 0 : index
      %c0_73 = arith.constant 0 : index
      %92 = vector.load %arg22[%c0_72, %c0_73] : memref<16x32xf32, #tpu.memory_space<vmem>>, vector<16x32xf32>
      tpu.vector_store %arg22[%c0_72, %c0_73], %91 {strides = array<i32>} : memref<16x32xf32, #tpu.memory_space<vmem>>, vector<16x32xf32>,
      %c0_74 = arith.constant 0 : index
      %c0_75 = arith.constant 0 : index
      %93 = vector.load %arg6[%c0_74, %c0_75] : memref<16x3xf32, #tpu.memory_space<vmem>>, vector<16x3xf32>
      %c0_76 = arith.constant 0 : index
      %c0_77 = arith.constant 0 : index
      %94 = vector.load %arg27[%c0_76, %c0_77] : memref<1x3xf32, #tpu.memory_space<vmem>>, vector<1x3xf32>
      %95 = vector.broadcast %94 : vector<1x3xf32> to vector<16x3xf32>
      %96 = arith.addf %93, %95 : vector<16x3xf32>
      %c0_78 = arith.constant 0 : index
      %c0_79 = arith.constant 0 : index
      %97 = vector.load %arg23[%c0_78, %c0_79] : memref<16x3xf32, #tpu.memory_space<vmem>>, vector<16x3xf32>
      tpu.vector_store %arg23[%c0_78, %c0_79], %96 {strides = array<i32>} : memref<16x3xf32, #tpu.memory_space<vmem>>, vector<16x3xf32>,
    } else {
    }
    return
  }
  func.func @transform_0(%arg0: i32) -> (i32, i32) {
    %c0_i32 = arith.constant 0 : i32
    %c0_i32_0 = arith.constant 0 : i32
    return %arg0, %c0_i32 : i32, i32
  }
  func.func @transform_1(%arg0: i32) -> (i32, i32) {
    %c0_i32 = arith.constant 0 : i32
    %c0_i32_0 = arith.constant 0 : i32
    return %arg0, %c0_i32 : i32, i32
  }
  func.func @transform_2(%arg0: i32) -> (i32, i32) {
    %c0_i32 = arith.constant 0 : i32
    %c0_i32_0 = arith.constant 0 : i32
    return %c0_i32, %arg0 : i32, i32
  }
  func.func @transform_3(%arg0: i32) -> (i32, i32) {
    %c0_i32 = arith.constant 0 : i32
    %c0_i32_0 = arith.constant 0 : i32
    return %arg0, %c0_i32 : i32, i32
  }
  func.func @transform_4(%arg0: i32) -> (i32, i32) {
    %c0_i32 = arith.constant 0 : i32
    %c0_i32_0 = arith.constant 0 : i32
    %c0_i32_1 = arith.constant 0 : i32
    return %c0_i32, %c0_i32_0 : i32, i32
  }
  func.func @transform_5(%arg0: i32) -> (i32, i32) {
    %c0_i32 = arith.constant 0 : i32
    %c0_i32_0 = arith.constant 0 : i32
    %c0_i32_1 = arith.constant 0 : i32
    return %c0_i32, %c0_i32_0 : i32, i32
  }
  func.func @transform_6(%arg0: i32) -> (i32, i32) {
    %c0_i32 = arith.constant 0 : i32
    %c0_i32_0 = arith.constant 0 : i32
    %c0_i32_1 = arith.constant 0 : i32
    return %c0_i32, %c0_i32_0 : i32, i32
  }
  func.func @transform_7(%arg0: i32) -> (i32, i32) {
    %c0_i32 = arith.constant 0 : i32
    %c0_i32_0 = arith.constant 0 : i32
    %c0_i32_1 = arith.constant 0 : i32
    return %c0_i32, %c0_i32_0 : i32, i32
  }
  func.func @transform_8(%arg0: i32) -> (i32, i32) {
    %c0_i32 = arith.constant 0 : i32
    %c0_i32_0 = arith.constant 0 : i32
    %c0_i32_1 = arith.constant 0 : i32
    return %c0_i32, %c0_i32_0 : i32, i32
  }
  func.func @transform_9(%arg0: i32) -> (i32, i32) {
    %c0_i32 = arith.constant 0 : i32
    %c0_i32_0 = arith.constant 0 : i32
    %c0_i32_1 = arith.constant 0 : i32
    return %c0_i32, %c0_i32_0 : i32, i32
  }
  func.func @transform_10(%arg0: i32) -> (i32, i32) {
    %c0_i32 = arith.constant 0 : i32
    %c0_i32_0 = arith.constant 0 : i32
    %c0_i32_1 = arith.constant 0 : i32
    return %c0_i32, %c0_i32_0 : i32, i32
  }
  func.func @transform_11(%arg0: i32) -> (i32, i32) {
    %c0_i32 = arith.constant 0 : i32
    %c0_i32_0 = arith.constant 0 : i32
    %c0_i32_1 = arith.constant 0 : i32
    return %c0_i32, %c0_i32_0 : i32, i32
  }
  func.func @transform_12(%arg0: i32) -> (i32, i32) {
    %c0_i32 = arith.constant 0 : i32
    %c0_i32_0 = arith.constant 0 : i32
    %c0_i32_1 = arith.constant 0 : i32
    return %c0_i32, %c0_i32_0 : i32, i32
  }
  func.func @transform_13(%arg0: i32) -> (i32, i32) {
    %c0_i32 = arith.constant 0 : i32
    %c0_i32_0 = arith.constant 0 : i32
    %c0_i32_1 = arith.constant 0 : i32
    return %c0_i32, %c0_i32_0 : i32, i32
  }
  func.func @transform_14(%arg0: i32) -> (i32, i32) {
    %c0_i32 = arith.constant 0 : i32
    %c0_i32_0 = arith.constant 0 : i32
    %c0_i32_1 = arith.constant 0 : i32
    return %c0_i32, %c0_i32_0 : i32, i32
  }
  func.func @transform_15(%arg0: i32) -> (i32, i32) {
    %c0_i32 = arith.constant 0 : i32
    %c0_i32_0 = arith.constant 0 : i32
    %c0_i32_1 = arith.constant 0 : i32
    return %c0_i32, %c0_i32_0 : i32, i32
  }
  func.func @transform_16(%arg0: i32) -> (i32, i32) {
    %c0_i32 = arith.constant 0 : i32
    %c0_i32_0 = arith.constant 0 : i32
    %c0_i32_1 = arith.constant 0 : i32
    return %c0_i32, %c0_i32_0 : i32, i32
  }
  func.func @transform_17(%arg0: i32) -> (i32, i32) {
    %c0_i32 = arith.constant 0 : i32
    %c0_i32_0 = arith.constant 0 : i32
    %c0_i32_1 = arith.constant 0 : i32
    return %c0_i32, %c0_i32_0 : i32, i32
  }
  func.func @transform_18(%arg0: i32) -> (i32, i32) {
    %c0_i32 = arith.constant 0 : i32
    %c0_i32_0 = arith.constant 0 : i32
    %c0_i32_1 = arith.constant 0 : i32
    return %c0_i32, %c0_i32_0 : i32, i32
  }
  func.func @transform_19(%arg0: i32) -> (i32, i32) {
    %c0_i32 = arith.constant 0 : i32
    %c0_i32_0 = arith.constant 0 : i32
    %c0_i32_1 = arith.constant 0 : i32
    return %c0_i32, %c0_i32_0 : i32, i32
  }
  func.func @transform_20(%arg0: i32) -> (i32, i32) {
    %c0_i32 = arith.constant 0 : i32
    %c0_i32_0 = arith.constant 0 : i32
    %c0_i32_1 = arith.constant 0 : i32
    return %c0_i32, %c0_i32_0 : i32, i32
  }
  func.func @transform_21(%arg0: i32) -> (i32, i32) {
    %c0_i32 = arith.constant 0 : i32
    %c0_i32_0 = arith.constant 0 : i32
    %c0_i32_1 = arith.constant 0 : i32
    return %c0_i32, %c0_i32_0 : i32, i32
  }
  func.func @transform_22(%arg0: i32) -> (i32, i32) {
    %c0_i32 = arith.constant 0 : i32
    %c0_i32_0 = arith.constant 0 : i32
    %c0_i32_1 = arith.constant 0 : i32
    return %c0_i32, %c0_i32_0 : i32, i32
  }
}

</mosaic_0001>

<bundles_post_ra>
// kernel: tpu_custom_call.1
= control target key start
LH: loop header
LB: loop body
LE: loop exit
PB: predicated region body
PF: predicated region fallthrough
CT: control target
= control target key end

     0   :  { %s4305_s0 = inlined_call_operand.vmem [shape: s32[384,1], index: 0, kind: input, shape index: {}]   ;;  %s4306_s1 = inlined_call_operand.vmem [shape: s32[384,1], index: 1, kind: input, shape index: {}]   ;;  %s4307_s2 = inlined_call_operand.vmem [shape: s32[1,384], index: 2, kind: input, shape index: {}]   ;;  %s4308_s3 = inlined_call_operand.vmem [shape: f32[384,5], index: 3, kind: input, shape index: {}]   ;;  %s4309_s4 = inlined_call_operand.vmem [shape: f32[16,8], index: 4, kind: input, shape index: {}]   ;;  %s4310_s5 = inlined_call_operand.vmem [shape: f32[16,3], index: 5, kind: input, shape index: {}]   ;;  %s4311_s6 = inlined_call_operand.vmem [shape: f32[8,32], index: 6, kind: input, shape index: {}]   ;;  %s4312_s7 = inlined_call_operand.vmem [shape: f32[8,32], index: 7, kind: input, shape index: {}]   ;;  %s4313_s8 = inlined_call_operand.vmem [shape: f32[5,32], index: 8, kind: input, shape index: {}]   ;;  %s4314_s9 = inlined_call_operand.vmem [shape: f32[1,32], index: 9, kind: input, shape index: {}]   ;;  %s4315_s10 = inlined_call_operand.vmem [shape: f32[32,32], index: 10, kind: input, shape index: {}]   ;;  %s4316_s11 = inlined_call_operand.vmem [shape: f32[1,32], index: 11, kind: input, shape index: {}]   ;;  %s4317_s12 = inlined_call_operand.vmem [shape: f32[8,32], index: 12, kind: input, shape index: {}]   ;;  %s4318_s13 = inlined_call_operand.vmem [shape: f32[32,32], index: 13, kind: input, shape index: {}]   ;;  %s4319_s14 = inlined_call_operand.vmem [shape: f32[1,32], index: 14, kind: input, shape index: {}]   ;;  %s4320_s15 = inlined_call_operand.vmem [shape: f32[32,32], index: 15, kind: input, shape index: {}]   ;;  %s4321_s16 = inlined_call_operand.vmem [shape: f32[1,32], index: 16, kind: input, shape index: {}]   ;;  %s4322_s17 = inlined_call_operand.vmem [shape: f32[1,32], index: 17, kind: input, shape index: {}]   ;;  %s4323_s18 = inlined_call_operand.<no memory space> [shape: f32[1,1], index: 18, kind: input, shape index: {}]   ;;  %s4324_s19 = inlined_call_operand.<no memory space> [shape: f32[1,1], index: 19, kind: input, shape index: {}]   ;;  %s4325_s20 = inlined_call_operand.<no memory space> [shape: f32[1,1], index: 20, kind: input, shape index: {}]   ;;  %s4326_s21 = inlined_call_operand.hbm [shape: f32[16,32], index: 21, kind: output, shape index: {0}]   ;;  %s4327_s22 = inlined_call_operand.vmem [shape: f32[16,3], index: 22, kind: output, shape index: {1}]  }
   0x1   :  { %4334 = sst [smem:[#allocation13_spill]] %s4305_s0 }
   0x2   :  { %4335 = sst [smem:[#allocation14_spill]] %s4306_s1 }
   0x3   :  { %4336 = sst [smem:[#allocation15_spill]] %s4307_s2 }
   0x4   :  { %4337 = sst [smem:[#allocation16_spill]] %s4308_s3 }
   0x5   :  { %4338 = sst [smem:[#allocation17_spill]] %s4309_s4 }
   0x6   :  { %4339 = sst [smem:[#allocation18_spill]] %s4310_s5 }
   0x7   :  { %4340 = sst [smem:[#allocation19_spill]] %s4311_s6 }
   0x8   :  { %4341 = sst [smem:[#allocation20_spill]] %s4321_s16 }
   0x9   :  { %4342 = sst [smem:[#allocation21_spill]] %s4326_s21 }
   0xa   :  { %28 = sst [smem:[#allocation6]] %s4323_s18 }
   0xb   :  { %29 = sst [smem:[#allocation7]] %s4324_s19 }
   0xc   :  { %30 = sst [smem:[#allocation8]] %s4325_s20 }
   0xd   :  { %31 = vsyncpa [#allocation10], 0  ;;  %s3605_s23 = smov 0  }
   0xe LB: > { %4343 = sst [smem:[#allocation12_spill]] %s3472_s23  ;;  %s3611_s18 = sadd.s32 4294967295, %s3472_s23   ;;  %s3472_s23 = sphi %s3605_s23, %s37_s23  }
   0xf   : > { %p2852_p0 = scmp.ge.s32.totalorder %s3472_s23, 1  ;;  %p640_p1 = scmp.lt.s32.totalorder %s3472_s23, 4 }
  0x11   : > { %p641_p2 = pnand %p2852_p0, %p640_p1 }
  0x12   : > { %s2853_s19 = sshll.u32 (!%p641_p2), %s3611_s18, 4  ;;  %p722_p3 = scmp.lt.s32.totalorder (!%p641_p2), %s3611_s18, 2 }
  0x13   : > { %644 = sbr.rel (%p641_p2) target bundleno = 1621 (0x655), region = 104  ;;  %p711_p4 = scmp.lt.s32.totalorder (!%p641_p2), %s2853_s19, 47 }
  0x14   : > { %s4344_s24 = sld [smem:[#allocation15_spill]] (!%p641_p2)  ;;  %s4345_s27 = sld [smem:[#allocation13_spill]] (!%p641_p2) }
  0x15   : > { %s4346_s30 = sld [smem:[#allocation14_spill]] (!%p641_p2)  ;;  %s4347_s21 = sld [smem:[#allocation16_spill]] (!%p641_p2) }
  0x16   : > { %p2859_p5 = scmp.ne.s32.totalorder (!%p641_p2), %s3611_s18, 0 }
  0x1a   : > { %s3618_s20 = scalar_select %p722_p3, %s3611_s18, 2 }
  0x1b   : > { %s4366_s19 = smov (!%p711_p4, %s2853_s19), 47  ;;  %734 = sbr.rel (%p2859_p5) target bundleno = 254 (0xfe), region = 108 }
  0x1c   : > { %s724_s6 = scalar_lea.vmem %s4344_s24, %s3618_s20  ;;  %s2854_s25 = sshll.u32 %s4366_s19, 3  ;;  %v823_v1 = vld [vmem:[%s4312_s7] sm:$0xff] (!%p2859_p5)  ;;  %vm738_vm0 = vcmask (!%p2859_p5), 64512   ;;  %vm820_vm1 = vcmask (!%p2859_p5), 261120   ;;  %vm903_vm2 = vcmask (!%p2859_p5), 16384   ;;  %v3474_v4 = vmov (!%p2859_p5), 0.0  }
  0x1d   : > { %s3627_s3 = scalar_lea.vmem %s4345_s27, %s2854_s25  ;;  %s3632_s4 = scalar_lea.vmem %s4346_s30, %s2854_s25  ;;  %3100 = vmatprep.subr.mxu1 (!%p2859_p5), %v823_v1  ;;  %901 = vst.msk [vmem:[#allocation4] sm:$0xff] (!%p2859_p5), %vm820_vm1, %v3474_v4  ;;  %902 = vst.msk [vmem:[#allocation4 + $0x8] sm:$0xff] (!%p2859_p5), %vm820_vm1, %v3474_v4 }
  0x1e   : > { %s3637_s16 = scalar_lea.vmem %s4347_s21, %s2854_s25  ;;  %s4348_s5 = sld [smem:[#allocation19_spill]] (!%p2859_p5)  ;;  %3101 = vmatpush3.msra.mxu1 (!%p2859_p5), %v823_v1  ;;  %904 = vst.msk [vmem:[#allocation5] sm:$0x1] (!%p2859_p5), %vm903_vm2, %v3474_v4 }
  0x1f   : > { %s4349_s28 = sld [smem:[#allocation17_spill]] (!%p2859_p5) }
  0x24   : > { %v737_v0 = vld [vmem:[%s4348_s5] sm:$0xff] }
  0x25   : > { %v735_v2 = vld [vmem:[%s4349_s28] sm:$0xff]  ;;  %3095 = vmatprep.subr.mxu0 %v737_v0  ;;  %v736_v3 = vld [vmem:[%s4349_s28 + $0x8] sm:$0xff] }
  0x26   : > { %3096 = vmatpush3.msra.mxu0 %v737_v0  ;;  %3097 = vmatprep.mubr.msk.f32.mxu0 %vm738_vm0, %v735_v2 }
  0x27   : > { %3102 = vmatprep.mubr.msk.f32.mxu1 %vm738_vm0, %v735_v2  ;;  %3098 = vmatmul.mubr.msk.f32.vlgmr.msra.gmra.mrb[0].mxu0 %vm738_vm0, %v736_v3 }
  0x28   : > { %3103 = vmatmul.mubr.msk.f32.vlgmr.msra.gmra.mrb[0].mxu1 %vm738_vm0, %v736_v3 }
  0xfa   : > { %v3099_v5 = vpop.f32.mrb[0].mxu0 }
  0xfb   : > { %v3104_v6 = vpop.f32.mrb[0].mxu1  ;;  %822 = vst.msk [vmem:[#allocation2 + $0x8] sm:$0xff] %vm820_vm1, %v3099_v5  ;;  %v811_v7 = vpop.f32.mrb[1].mxu0 }
  0xfc   : > { %900 = vst.msk [vmem:[#allocation3 + $0x8] sm:$0xff] %vm820_vm1, %v3104_v6  ;;  %v890_v8 = vpop.f32.mrb[1].mxu1  ;;  %821 = vst.msk [vmem:[#allocation2] sm:$0xff] %vm820_vm1, %v811_v7 }
  0xfd   : > { %899 = vst.msk [vmem:[#allocation3] sm:$0xff] %vm820_vm1, %v890_v8 }
  0xfe PF: > { %v1005_v9 = vld [vmem:[%s3632_s4 + $0x10] sm:$0xff]  ;;  %v1003_v10 = vld [vmem:[%s3632_s4] sm:$0xff]  ;;  %v3475_v11 = vmov 0   ;;  %v1006_v12 = vld [vmem:[%s3632_s4 + $0x18] sm:$0xff]  ;;  %v905_v48 = vlaneseq  ;;  %vm1103_vm3 = vcmask 130048   ;;  %v3476_v52 = vmov 0.0  }
  0xff   : > { %3435 = vset.pattern.permute.xlu1 %v3475_v11  ;;  %3434 = vset.pattern.permute.xlu0 %v3475_v11  ;;  %v1004_v13 = vld [vmem:[%s3632_s4 + $0x8] sm:$0xff]  ;;  %v1007_v15 = vld [vmem:[%s3632_s4 + $0x20] sm:$0xff]  ;;  %v1010_v16 = vld [vmem:[%s3632_s4 + $0x38] sm:$0xff]  ;;  %vm1556_vm7 = vcmask 1044480   ;;  %s4351_s29 = sld [smem:[#allocation18_spill]]  ;;  %s2129_s0 = sld [smem:[#allocation6]] }
 0x100   : > { %1026 = vperm.xlu1 %3435, %v1005_v9   ;;  %1020 = vperm.xlu0 %3434, %v1003_v10   ;;  %v1008_v14 = vld [vmem:[%s3632_s4 + $0x28] sm:$0xff]  ;;  %v1009_v17 = vld [vmem:[%s3632_s4 + $0x30] sm:$0xff]  ;;  %v1011_v25 = vld [vmem:[%s3632_s4 + $0x40] sm:$0xff]  ;;  %v3688_v49 = vand.u32 127, %v905_v48  ;;  %s2163_s1 = sld [smem:[#allocation7]]  ;;  %p2951_p6 = scmp.ne.s32.totalorder %s3611_s18, 2 }
 0x101   : > { %v1012_v24 = vld [vmem:[%s3632_s4 + $0x48] sm:$0xff]  ;;  %v907_v27 = vld [vmem:[%s3627_s3] sm:$0xff]  ;;  %v910_v28 = vld [vmem:[%s3627_s3 + $0x18] sm:$0xff]  ;;  %s2181_s19 = sld [smem:[#allocation8]]  ;;  %s4361_s23 = sld [smem:[#allocation18_spill]] (!%p2951_p6) }
 0x102   : > { %v1100_v21 = vld [vmem:[#allocation2 + $0x8] sm:$0xff]  ;;  %v909_v29 = vld [vmem:[%s3627_s3 + $0x10] sm:$0xff]  ;;  %v911_v31 = vld [vmem:[%s3627_s3 + $0x20] sm:$0xff] }
 0x103   : > { %v1102_v19 = vld [vmem:[#allocation3 + $0x8] sm:$0xff]  ;;  %v1099_v20 = vld [vmem:[#allocation2] sm:$0xff]  ;;  %v908_v26 = vld [vmem:[%s3627_s3 + $0x8] sm:$0xff] }
 0x104   : > { %1029 = vperm.xlu1 %3435, %v1006_v12   ;;  %1023 = vperm.xlu0 %3434, %v1004_v13   ;;  %v1101_v18 = vld [vmem:[#allocation3] sm:$0xff]  ;;  %v3660_v23 = vpack.c.bf16 %v1100_v21, %v1099_v20  ;;  %v912_v30 = vld [vmem:[%s3627_s3 + $0x28] sm:$0xff]  ;;  %v914_v32 = vld [vmem:[%s3627_s3 + $0x38] sm:$0xff] }
 0x105   : > { %v3309_v22 = vpack.c.bf16 %v1102_v19, %v1101_v18  ;;  %v913_v33 = vld [vmem:[%s3627_s3 + $0x30] sm:$0xff]  ;;  %v916_v34 = vld [vmem:[%s3627_s3 + $0x48] sm:$0xff]  ;;  %v915_v35 = vld [vmem:[%s3627_s3 + $0x40] sm:$0xff] }
 0x106   : > { %v918_v36 = vld [vmem:[%s3627_s3 + $0x58] sm:$0xff]  ;;  %v917_v37 = vld [vmem:[%s3627_s3 + $0x50] sm:$0xff]  ;;  %v920_v38 = vld [vmem:[%s3627_s3 + $0x68] sm:$0xff] }
 0x107   : > { %3310 = vmatprep.subr.bf16.mxu0 %v3309_v22  ;;  %3377 = vmatprep.subr.bf16.mxu1 %v3309_v22  ;;  %v919_v39 = vld [vmem:[%s3627_s3 + $0x60] sm:$0xff]  ;;  %v922_v40 = vld [vmem:[%s3627_s3 + $0x78] sm:$0xff]  ;;  %v921_v41 = vld [vmem:[%s3627_s3 + $0x70] sm:$0xff]  ;;  %s4360_s3 = sld [smem:[#allocation17_spill]] (!%p2951_p6) }
 0x108   : > { %1035 = vperm.xlu1 %3435, %v1008_v14   ;;  %1032 = vperm.xlu0 %3434, %v1007_v15   ;;  %v1014_v42 = vld [vmem:[%s3632_s4 + $0x58] sm:$0xff]  ;;  %v1013_v43 = vld [vmem:[%s3632_s4 + $0x50] sm:$0xff]  ;;  %v1016_v44 = vld [vmem:[%s3632_s4 + $0x68] sm:$0xff] }
 0x109   : > { %3312 = vmatpush3.bf16.msra.mxu0 %v3309_v22  ;;  %3378 = vmatpush3.bf16.msra.mxu1 %v3309_v22  ;;  %v1015_v45 = vld [vmem:[%s3632_s4 + $0x60] sm:$0xff]  ;;  %v1018_v46 = vld [vmem:[%s3632_s4 + $0x78] sm:$0xff]  ;;  %v1017_v47 = vld [vmem:[%s3632_s4 + $0x70] sm:$0xff] }
 0x10a   : > { %3314 = vmatprep.subr.bf16.mxu0 %v3660_v23  ;;  %v1506_v58 = vld [vmem:[%s4313_s8] sm:$0x1f] }
 0x10c   : > { %1041 = vperm.xlu1 %3435, %v1010_v16   ;;  %1038 = vperm.xlu0 %3434, %v1009_v17  }
 0x110   : > { %1047 = vperm.xlu1 %3435, %v1012_v24   ;;  %1044 = vperm.xlu0 %3434, %v1011_v25  }
 0x114   : > { %927 = vperm.xlu1 %3435, %v908_v26   ;;  %924 = vperm.xlu0 %3434, %v907_v27  }
 0x118   : > { %933 = vperm.xlu1 %3435, %v910_v28   ;;  %930 = vperm.xlu0 %3434, %v909_v29  }
 0x11c   : > { %939 = vperm.xlu1 %3435, %v912_v30   ;;  %936 = vperm.xlu0 %3434, %v911_v31  }
 0x120   : > { %945 = vperm.xlu1 %3435, %v914_v32   ;;  %942 = vperm.xlu0 %3434, %v913_v33  }
 0x124   : > { %951 = vperm.xlu1 %3435, %v916_v34   ;;  %948 = vperm.xlu0 %3434, %v915_v35  }
 0x128   : > { %957 = vperm.xlu1 %3435, %v918_v36   ;;  %954 = vperm.xlu0 %3434, %v917_v37  }
 0x12c   : > { %963 = vperm.xlu1 %3435, %v920_v38   ;;  %960 = vperm.xlu0 %3434, %v919_v39  }
 0x130   : > { %969 = vperm.xlu1 %3435, %v922_v40   ;;  %966 = vperm.xlu0 %3434, %v921_v41  }
 0x134   : > { %1053 = vperm.xlu1 %3435, %v1014_v42   ;;  %1050 = vperm.xlu0 %3434, %v1013_v43  }
 0x138   : > { %1059 = vperm.xlu1 %3435, %v1016_v44   ;;  %1056 = vperm.xlu0 %3434, %v1015_v45  }
 0x13c   : > { %1065 = vperm.xlu1 %3435, %v1018_v46   ;;  %1062 = vperm.xlu0 %3434, %v1017_v47  }
 0x17f   : > { %v1027_v50 = vpop.permute.xlu1 %1026  ;;  %v1021_v51 = vpop.permute.xlu0 %1020 }
 0x180   : > { %vm1067_vm4 = vcmp.eq.s32.totalorder %v1021_v51, %v3688_v49  ;;  %vm1069_vm5 = vcmp.eq.s32.totalorder %v1027_v50, %v3688_v49 }
 0x181   : > { %v3693_v53 = vsel %vm1067_vm4, 1.0, %v3476_v52  ;;  %v3698_v56 = vsel %vm1069_vm5, 1.0, %v3476_v52 }
 0x182   : > { %3109 = vmatprep.mubr.msk.f32.mxu0 %vm1103_vm3, %v3693_v53 }
 0x183   : > { %v1030_v54 = vpop.permute.xlu1 %1029  ;;  %v1024_v55 = vpop.permute.xlu0 %1023 }
 0x184   : > { %vm1068_vm6 = vcmp.eq.s32.totalorder %v1024_v55, %v3688_v49  ;;  %vm1070_vm8 = vcmp.eq.s32.totalorder %v1030_v54, %v3688_v49  ;;  %v1490_v55 = vld [vmem:[%s3637_s16] sm:$0xff] }
 0x185   : > { %v3702_v57 = vsel %vm1068_vm6, 1.0, %v3476_v52  ;;  %v3716_v61 = vsel %vm1070_vm8, 1.0, %v3476_v52 }
 0x186   : > { %3110 = vmatmul.mubr.msk.f32.vlgmr.msra.gmra.mrb[0].mxu0 %vm1103_vm3, %v3702_v57 }
 0x187   : > { %v1036_v59 = vpop.permute.xlu1 %1035  ;;  %v1033_v60 = vpop.permute.xlu0 %1032  ;;  %3112 = vmatprep.mubr.msk.f32.mxu0 %vm1103_vm3, %v3698_v56  ;;  %3316 = vmatpush3.bf16.msra.mxu0 %v3660_v23 }
 0x188   : > { %vm1071_vm9 = vcmp.eq.s32.totalorder %v1033_v60, %v3688_v49  ;;  %3161 = vmatprep.subr.msk.mxu0 %vm1556_vm7, %v1506_v58  ;;  %vm1072_vm10 = vcmp.eq.s32.totalorder %v1036_v59, %v3688_v49 }
 0x189   : > { %v3719_v62 = vsel %vm1071_vm9, 1.0, %v3476_v52  ;;  %v3728_v1 = vsel %vm1072_vm10, 1.0, %v3476_v52 }
 0x18a   : > { %3113 = vmatmul.mubr.msk.f32.gmra.mrb[2].mxu0 %vm1103_vm3, %v3716_v61 }
 0x18b   : > { %v1042_v63 = vpop.permute.xlu1 %1041  ;;  %v1039_v0 = vpop.permute.xlu0 %1038  ;;  %3115 = vmatprep.mubr.msk.f32.mxu0 %vm1103_vm3, %v3719_v62 }
 0x18c   : > { %vm1073_vm11 = vcmp.eq.s32.totalorder %v1039_v0, %v3688_v49  ;;  %vm1074_vm12 = vcmp.eq.s32.totalorder %v1042_v63, %v3688_v49 }
 0x18d   : > { %v3731_v2 = vsel %vm1073_vm11, 1.0, %v3476_v52  ;;  %v3740_v5 = vsel %vm1074_vm12, 1.0, %v3476_v52 }
 0x18e   : > { %3116 = vmatmul.mubr.msk.f32.gmra.mrb[4].mxu0 %vm1103_vm3, %v3728_v1 }
 0x18f   : > { %v1048_v3 = vpop.permute.xlu1 %1047  ;;  %v1045_v4 = vpop.permute.xlu0 %1044  ;;  %3118 = vmatprep.mubr.msk.f32.mxu0 %vm1103_vm3, %v3731_v2 }
 0x190   : > { %vm1075_vm13 = vcmp.eq.s32.totalorder %v1045_v4, %v3688_v49  ;;  %vm1076_vm14 = vcmp.eq.s32.totalorder %v1048_v3, %v3688_v49 }
 0x191   : > { %v3743_v6 = vsel %vm1075_vm13, 1.0, %v3476_v52  ;;  %v3753_v9 = vsel %vm1076_vm14, 1.0, %v3476_v52 }
 0x192   : > { %3119 = vmatmul.mubr.msk.f32.gmra.mrb[6].mxu0 %vm1103_vm3, %v3740_v5 }
 0x193   : > { %v928_v7 = vpop.permute.xlu1 %927  ;;  %v925_v8 = vpop.permute.xlu0 %924  ;;  %3121 = vmatprep.mubr.msk.f32.mxu0 %vm1103_vm3, %v3743_v6 }
 0x194   : > { %vm972_vm15 = vcmp.eq.s32.totalorder %v928_v7, %v3688_v49  ;;  %vm971_vm0 = vcmp.eq.s32.totalorder %v925_v8, %v3688_v49  ;;  %v1491_v7 = vld [vmem:[%s3637_s16 + $0x8] sm:$0xff]  ;;  %v1492_v8 = vld [vmem:[%s3637_s16 + $0x10] sm:$0xff] }
 0x195   : > { %v3756_v10 = vsel %vm972_vm15, 1.0, %v3476_v52  ;;  %v3759_v11 = vsel %vm971_vm0, 1.0, %v3476_v52 }
 0x196   : > { %v2200_v12 = vsub.f32 %v3756_v10, %v3702_v57  ;;  %v2199_v13 = vsub.f32 %v3759_v11, %v3693_v53  ;;  %3122 = vmatmul.mubr.msk.f32.gmra.mrb[8].mxu0 %vm1103_vm3, %v3753_v9 }
 0x197   : > { %v934_v14 = vpop.permute.xlu1 %933  ;;  %v931_v15 = vpop.permute.xlu0 %930  ;;  %3137 = vmatprep.mubr.msk.f32.mxu0 %vm1103_vm3, %v3759_v11 }
 0x198   : > { %vm974_vm1 = vcmp.eq.s32.totalorder %v934_v14, %v3688_v49  ;;  %vm973_vm2 = vcmp.eq.s32.totalorder %v931_v15, %v3688_v49 }
 0x199   : > { %v3772_v16 = vsel %vm974_vm1, 1.0, %v3476_v52  ;;  %v3775_v17 = vsel %vm973_vm2, 1.0, %v3476_v52  ;;  %vm1507_vm2 = vcmask 39936  }
 0x19a   : > { %v2202_v18 = vsub.f32 %v3772_v16, %v3716_v61  ;;  %v2201_v19 = vsub.f32 %v3775_v17, %v3698_v56  ;;  %3138 = vmatmul.mubr.msk.f32.vlgmr.msra.gmra.mrb[0].mxu0 %vm1103_vm3, %v3756_v10 }
 0x19b   : > { %v940_v20 = vpop.permute.xlu1 %939  ;;  %v937_v21 = vpop.permute.xlu0 %936  ;;  %3140 = vmatprep.mubr.msk.f32.mxu0 %vm1103_vm3, %v3775_v17  ;;  %3162 = vmatpush3.msk.msra.mxu0 %vm1556_vm7, %v1506_v58 }
 0x19c   : > { %vm976_vm4 = vcmp.eq.s32.totalorder %v940_v20, %v3688_v49  ;;  %vm975_vm5 = vcmp.eq.s32.totalorder %v937_v21, %v3688_v49 }
 0x19d   : > { %v3789_v22 = vsel %vm976_vm4, 1.0, %v3476_v52  ;;  %v3792_v23 = vsel %vm975_vm5, 1.0, %v3476_v52 }
 0x19e   : > { %v2204_v24 = vsub.f32 %v3789_v22, %v3728_v1  ;;  %v2203_v25 = vsub.f32 %v3792_v23, %v3719_v62  ;;  %3141 = vmatmul.mubr.msk.f32.gmra.mrb[2].mxu0 %vm1103_vm3, %v3772_v16 }
 0x19f   : > { %v946_v26 = vpop.permute.xlu1 %945  ;;  %v943_v27 = vpop.permute.xlu0 %942  ;;  %3143 = vmatprep.mubr.msk.f32.mxu0 %vm1103_vm3, %v3792_v23 }
 0x1a0   : > { %vm978_vm6 = vcmp.eq.s32.totalorder %v946_v26, %v3688_v49  ;;  %vm977_vm7 = vcmp.eq.s32.totalorder %v943_v27, %v3688_v49 }
 0x1a1   : > { %v3805_v28 = vsel %vm978_vm6, 1.0, %v3476_v52  ;;  %v3808_v29 = vsel %vm977_vm7, 1.0, %v3476_v52 }
 0x1a2   : > { %v2206_v30 = vsub.f32 %v3805_v28, %v3740_v5  ;;  %v2205_v31 = vsub.f32 %v3808_v29, %v3731_v2  ;;  %3144 = vmatmul.mubr.msk.f32.gmra.mrb[4].mxu0 %vm1103_vm3, %v3789_v22 }
 0x1a3   : > { %v952_v32 = vpop.permute.xlu1 %951  ;;  %v949_v33 = vpop.permute.xlu0 %948  ;;  %3146 = vmatprep.mubr.msk.f32.mxu0 %vm1103_vm3, %v3808_v29 }
 0x1a4   : > { %vm980_vm8 = vcmp.eq.s32.totalorder %v952_v32, %v3688_v49  ;;  %vm979_vm9 = vcmp.eq.s32.totalorder %v949_v33, %v3688_v49  ;;  %v1493_v32 = vld [vmem:[%s3637_s16 + $0x18] sm:$0xff]  ;;  %v1494_v33 = vld [vmem:[%s3637_s16 + $0x20] sm:$0xff] }
 0x1a5   : > { %v3821_v34 = vsel %vm980_vm8, 1.0, %v3476_v52  ;;  %v3824_v35 = vsel %vm979_vm9, 1.0, %v3476_v52  ;;  %vm1771_vm8 = vcmask 261120  }
 0x1a6   : > { %3147 = vmatmul.mubr.msk.f32.gmra.mrb[6].mxu0 %vm1103_vm3, %v3805_v28  ;;  %v4352_v53 = vsub.f32 %v3824_v35, %v3743_v6  ;;  %v4353_v56 = vsub.f32 %v3821_v34, %v3753_v9 }
 0x1a7   : > { %v958_v38 = vpop.permute.xlu1 %957  ;;  %v955_v39 = vpop.permute.xlu0 %954  ;;  %3149 = vmatprep.mubr.msk.f32.mxu0 %vm1103_vm3, %v3824_v35 }
 0x1a8   : > { %vm981_vm10 = vcmp.eq.s32.totalorder %v955_v39, %v3688_v49  ;;  %vm982_vm11 = vcmp.eq.s32.totalorder %v958_v38, %v3688_v49 }
 0x1a9   : > { %v3836_v40 = vsel %vm981_vm10, 1.0, %v3476_v52  ;;  %v3845_v43 = vsel %vm982_vm11, 1.0, %v3476_v52  ;;  %vm2466_vm11 = vcmask 16384  }
 0x1aa   : > { %3150 = vmatmul.mubr.msk.f32.gmra.mrb[8].mxu0 %vm1103_vm3, %v3821_v34 }
 0x1ab   : > { %v964_v41 = vpop.permute.xlu1 %963  ;;  %v961_v42 = vpop.permute.xlu0 %960  ;;  %3152 = vmatprep.mubr.msk.f32.mxu0 %vm1103_vm3, %v3836_v40 }
 0x1ac   : > { %vm983_vm12 = vcmp.eq.s32.totalorder %v961_v42, %v3688_v49  ;;  %vm984_vm13 = vcmp.eq.s32.totalorder %v964_v41, %v3688_v49 }
 0x1ad   : > { %v3848_v44 = vsel %vm983_vm12, 1.0, %v3476_v52  ;;  %v3857_v47 = vsel %vm984_vm13, 1.0, %v3476_v52  ;;  %vm2562_vm12 = vcmask (!%p2951_p6), 64512  }
 0x1ae   : > { %3153 = vmatmul.mubr.msk.f32.gmra.mrb[10].mxu0 %vm1103_vm3, %v3845_v43 }
 0x1af   : > { %v970_v45 = vpop.permute.xlu1 %969  ;;  %v967_v46 = vpop.permute.xlu0 %966  ;;  %3155 = vmatprep.mubr.msk.f32.mxu0 %vm1103_vm3, %v3848_v44 }
 0x1b0   : > { %vm985_vm14 = vcmp.eq.s32.totalorder %v967_v46, %v3688_v49  ;;  %vm986_vm15 = vcmp.eq.s32.totalorder %v970_v45, %v3688_v49  ;;  %v1497_v45 = vld [vmem:[%s3637_s16 + $0x38] sm:$0xff]  ;;  %v1498_v46 = vld [vmem:[%s3637_s16 + $0x40] sm:$0xff] }
 0x1b1   : > { %v3860_v50 = vsel %vm985_vm14, 1.0, %v3476_v52  ;;  %v3871_v58 = vsel %vm986_vm15, 1.0, %v3476_v52 }
 0x1b2   : > { %3156 = vmatmul.mubr.msk.f32.gmra.mrb[12].mxu0 %vm1103_vm3, %v3857_v47 }
 0x1b3   : > { %v1054_v51 = vpop.permute.xlu1 %1053  ;;  %v1051_v54 = vpop.permute.xlu0 %1050  ;;  %3158 = vmatprep.mubr.msk.f32.mxu0 %vm1103_vm3, %v3860_v50 }
 0x1b4   : > { %vm1078_vm0 = vcmp.eq.s32.totalorder %v1054_v51, %v3688_v49  ;;  %vm1077_vm1 = vcmp.eq.s32.totalorder %v1051_v54, %v3688_v49  ;;  %v1499_v51 = vld [vmem:[%s3637_s16 + $0x48] sm:$0xff]  ;;  %v1500_v54 = vld [vmem:[%s3637_s16 + $0x50] sm:$0xff] }
 0x1b5   : > { %v3874_v59 = vsel %vm1078_vm0, 1.0, %v3476_v52  ;;  %v3877_v60 = vsel %vm1077_vm1, 1.0, %v3476_v52 }
 0x1b6   : > { %3124 = vmatprep.mubr.msk.f32.mxu1 %vm1103_vm3, %v3877_v60  ;;  %3159 = vmatmul.mubr.msk.f32.gmra.mrb[14].mxu0 %vm1103_vm3, %v3871_v58  ;;  %v4354_v57 = vsub.f32 %v3836_v40, %v3877_v60  ;;  %v4355_v61 = vsub.f32 %v3845_v43, %v3874_v59  ;;  %v1977_v43 = vld [vmem:[#allocation4] sm:$0xff]  ;;  %v4159_v60 = vstv %s2181_s19 }
 0x1b7   : > { %v1060_v3 = vpop.permute.xlu1 %1059  ;;  %v1057_v4 = vpop.permute.xlu0 %1056  ;;  %3125 = vmatmul.mubr.msk.f32.vlgmr.msra.gmra.mrb[0].mxu1 %vm1103_vm3, %v3874_v59  ;;  %3163 = vmatprep.mubr.msk.f32.mxu0 %vm1507_vm2, %v1490_v55  ;;  %v1501_v55 = vld [vmem:[%s3637_s16 + $0x58] sm:$0xff] }
 0x1b8   : > { %vm1080_vm4 = vcmp.eq.s32.totalorder %v1060_v3, %v3688_v49  ;;  %vm1079_vm5 = vcmp.eq.s32.totalorder %v1057_v4, %v3688_v49  ;;  %v1502_v3 = vld [vmem:[%s3637_s16 + $0x60] sm:$0xff]  ;;  %v1503_v4 = vld [vmem:[%s3637_s16 + $0x68] sm:$0xff] }
 0x1b9   : > { %v3895_v14 = vsel %vm1080_vm4, 1.0, %v3476_v52  ;;  %v3898_v15 = vsel %vm1079_vm5, 1.0, %v3476_v52 }
 0x1ba   : > { %3127 = vmatprep.mubr.msk.f32.mxu1 %vm1103_vm3, %v3898_v15  ;;  %3164 = vmatmul.mubr.msk.f32.vlgmr.msra.gmra.mrb[0].mxu0 %vm1507_vm2, %v1491_v7  ;;  %v1504_v7 = vld [vmem:[%s3637_s16 + $0x70] sm:$0xff]  ;;  %v4356_v62 = vsub.f32 %v3848_v44, %v3898_v15  ;;  %v4357_v1 = vsub.f32 %v3857_v47, %v3895_v14 }
 0x1bb   : > { %v1066_v26 = vpop.permute.xlu1 %1065  ;;  %v1063_v27 = vpop.permute.xlu0 %1062  ;;  %3128 = vmatmul.mubr.msk.f32.gmra.mrb[2].mxu1 %vm1103_vm3, %v3895_v14  ;;  %3166 = vmatprep.mubr.msk.f32.mxu0 %vm1507_vm2, %v1492_v8  ;;  %v1505_v8 = vld [vmem:[%s3637_s16 + $0x78] sm:$0xff] }
 0x1bc   : > { %vm1082_vm6 = vcmp.eq.s32.totalorder %v1066_v26, %v3688_v49  ;;  %vm1081_vm7 = vcmp.eq.s32.totalorder %v1063_v27, %v3688_v49  ;;  %v1495_v49 = vld [vmem:[%s3637_s16 + $0x28] sm:$0xff]  ;;  %v1760_v26 = vld [vmem:[%s4315_s10] sm:$0xff] }
 0x1bd   : > { %v3915_v38 = vsel %vm1082_vm6, 1.0, %v3476_v52  ;;  %v3918_v39 = vsel %vm1081_vm7, 1.0, %v3476_v52  ;;  %v1496_v52 = vld [vmem:[%s3637_s16 + $0x30] sm:$0xff]  ;;  %v1761_v27 = vld [vmem:[%s4315_s10 + $0x8] sm:$0xff] }
 0x1be   : > { %3130 = vmatprep.mubr.msk.f32.mxu1 %vm1103_vm3, %v3918_v39  ;;  %3167 = vmatmul.mubr.msk.f32.gmra.mrb[2].mxu0 %vm1507_vm2, %v1493_v32  ;;  %v3317_v32 = vpack.c.bf16 %v1761_v27, %v1760_v26  ;;  %v4358_v2 = vsub.f32 %v3860_v50, %v3918_v39  ;;  %v4359_v5 = vsub.f32 %v3871_v58, %v3915_v38 }
 0x1bf   : > { %3131 = vmatmul.mubr.msk.f32.gmra.mrb[4].mxu1 %vm1103_vm3, %v3915_v38  ;;  %3169 = vmatprep.mubr.msk.f32.mxu0 %vm1507_vm2, %v1494_v33  ;;  %v1762_v33 = vld [vmem:[%s4315_s10 + $0x10] sm:$0xff] }
 0x1c0   : > { %3318 = vmatprep.subr.bf16.mxu1 %v3317_v32 }
 0x1c1   : > { %3320 = vmatpush3.bf16.msra.mxu1 %v3317_v32 }
 0x1c2   : > { %3170 = vmatmul.mubr.msk.f32.gmra.mrb[4].mxu0 %vm1507_vm2, %v1495_v49  ;;  %v1763_v49 = vld [vmem:[%s4315_s10 + $0x18] sm:$0xff] }
 0x1c3   : > { %3172 = vmatprep.mubr.msk.f32.mxu0 %vm1507_vm2, %v1496_v52  ;;  %v3321_v52 = vpack.c.bf16 %v1763_v49, %v1762_v33 }
 0x1c5   : > { %3322 = vmatprep.subr.bf16.mxu1 %v3321_v52 }
 0x1c6   : > { %3173 = vmatmul.mubr.msk.f32.gmra.mrb[6].mxu0 %vm1507_vm2, %v1497_v45  ;;  %3324 = vmatpush3.bf16.msra.mxu1 %v3321_v52 }
 0x1c7   : > { %3175 = vmatprep.mubr.msk.f32.mxu0 %vm1507_vm2, %v1498_v46 }
 0x1ca   : > { %3176 = vmatmul.mubr.msk.f32.gmra.mrb[8].mxu0 %vm1507_vm2, %v1499_v51  ;;  %v3967_v51 = vld [vmem:[%s4314_s9] ss:$0 sm:$0xff] }
 0x1cb   : > { %3178 = vmatprep.mubr.msk.f32.mxu0 %vm1507_vm2, %v1500_v54 }
 0x1ce   : > { %3179 = vmatmul.mubr.msk.f32.gmra.mrb[10].mxu0 %vm1507_vm2, %v1501_v55 }
 0x1cf   : > { %3181 = vmatprep.mubr.msk.f32.mxu0 %vm1507_vm2, %v1502_v3 }
 0x1d2   : > { %3182 = vmatmul.mubr.msk.f32.gmra.mrb[12].mxu0 %vm1507_vm2, %v1503_v4 }
 0x1d3   : > { %3184 = vmatprep.mubr.msk.f32.mxu0 %vm1507_vm2, %v1504_v7 }
 0x1d6   : > { %3185 = vmatmul.mubr.msk.f32.gmra.mrb[14].mxu0 %vm1507_vm2, %v1505_v8 }
 0x28a   : > { %v3126_v45 = vpop.f32.mrb[0].mxu1 }
 0x28b   : > { %v1268_v46 = vpop.f32.mrb[1].mxu1 }
 0x28d   : > { %v3165_v54 = vpop.f32.mrb[0].mxu0 }
 0x28e   : > { %v1729_v55 = vadd.f32 %v3165_v54, %v3967_v51  ;;  %v3129_v3 = vpop.f32.mrb[2].mxu1  ;;  %v1626_v4 = vpop.f32.mrb[1].mxu0 }
 0x28f   : > { %v1728_v7 = vadd.f32 %v3967_v51, %v1626_v4  ;;  %v1278_v8 = vpop.f32.mrb[3].mxu1 }
 0x290   : > { %v1745_v32 = vmax.f32 %v1729_v55, 0.0 }
 0x291   : > { %v1744_v26 = vmax.f32 %v1728_v7, 0.0  ;;  %v3168_v27 = vpop.f32.mrb[2].mxu0 }
 0x292   : > { %v1731_v33 = vadd.f32 %v3168_v27, %v3967_v51  ;;  %v3132_v49 = vpop.f32.mrb[4].mxu1  ;;  %v1636_v52 = vpop.f32.mrb[3].mxu0 }
 0x293   : > { %v1730_v41 = vadd.f32 %v3967_v51, %v1636_v52  ;;  %v1288_v42 = vpop.f32.mrb[5].mxu1  ;;  %3195 = vmatprep.mubr.msk.f32.mxu1 %vm1771_vm8, %v1744_v26 }
 0x294   : > { %3196 = vmatmul.mubr.msk.f32.vlgmr.msra.gmra.mrb[6].mxu1 %vm1771_vm8, %v1745_v32  ;;  %v1747_v21 = vmax.f32 %v1731_v33, 0.0 }
 0x295   : > { %v1746_v54 = vmax.f32 %v1730_v41, 0.0  ;;  %v3171_v20 = vpop.f32.mrb[4].mxu0 }
 0x296   : > { %v1733_v4 = vadd.f32 %v3171_v20, %v3967_v51  ;;  %v1646_v63 = vpop.f32.mrb[5].mxu0 }
 0x297   : > { %v1732_v7 = vadd.f32 %v3967_v51, %v1646_v63  ;;  %3198 = vmatprep.mubr.msk.f32.mxu1 %vm1771_vm8, %v1746_v54 }
 0x298   : > { %3199 = vmatmul.mubr.msk.f32.gmra.mrb[8].mxu1 %vm1771_vm8, %v1747_v21  ;;  %v1749_v52 = vmax.f32 %v1733_v4, 0.0 }
 0x299   : > { %v1748_v55 = vmax.f32 %v1732_v7, 0.0  ;;  %v3174_v27 = vpop.f32.mrb[6].mxu0 }
 0x29a   : > { %v1735_v0 = vadd.f32 %v3174_v27, %v3967_v51  ;;  %v1656_v26 = vpop.f32.mrb[7].mxu0 }
 0x29b   : > { %v1734_v32 = vadd.f32 %v3967_v51, %v1656_v26  ;;  %3201 = vmatprep.mubr.msk.f32.mxu1 %vm1771_vm8, %v1748_v55 }
 0x29c   : > { %3202 = vmatmul.mubr.msk.f32.gmra.mrb[10].mxu1 %vm1771_vm8, %v1749_v52  ;;  %v1751_v33 = vmax.f32 %v1735_v0, 0.0 }
 0x29d   : > { %v1750_v20 = vmax.f32 %v1734_v32, 0.0  ;;  %v3177_v41 = vpop.f32.mrb[8].mxu0 }
 0x29e   : > { %v1737_v63 = vadd.f32 %v3177_v41, %v3967_v51  ;;  %v1666_v54 = vpop.f32.mrb[9].mxu0 }
 0x29f   : > { %v1736_v21 = vadd.f32 %v3967_v51, %v1666_v54  ;;  %3204 = vmatprep.mubr.msk.f32.mxu1 %vm1771_vm8, %v1750_v20 }
 0x2a0   : > { %3205 = vmatmul.mubr.msk.f32.gmra.mrb[12].mxu1 %vm1771_vm8, %v1751_v33  ;;  %v1753_v27 = vmax.f32 %v1737_v63, 0.0 }
 0x2a1   : > { %v1752_v4 = vmax.f32 %v1736_v21, 0.0  ;;  %v3180_v7 = vpop.f32.mrb[10].mxu0 }
 0x2a2   : > { %v3379_v26 = vadd.f32 %v3180_v7, %v3126_v45  ;;  %v1676_v36 = vpop.f32.mrb[11].mxu0 }
 0x2a3   : > { %v3380_v55 = vadd.f32 %v1676_v36, %v1268_v46  ;;  %3207 = vmatprep.mubr.msk.f32.mxu1 %vm1771_vm8, %v1752_v4 }
 0x2a4   : > { %v1739_v52 = vadd.f32 %v3379_v26, %v3967_v51  ;;  %3208 = vmatmul.mubr.msk.f32.gmra.mrb[14].mxu1 %vm1771_vm8, %v1753_v27 }
 0x2a5   : > { %v1738_v0 = vadd.f32 %v3380_v55, %v3967_v51  ;;  %v3183_v32 = vpop.f32.mrb[12].mxu0 }
 0x2a6   : > { %v3381_v41 = vadd.f32 %v3183_v32, %v3129_v3  ;;  %v1686_v54 = vpop.f32.mrb[13].mxu0  ;;  %v1755_v33 = vmax.f32 %v1739_v52, 0.0 }
 0x2a7   : > { %v1754_v20 = vmax.f32 %v1738_v0, 0.0  ;;  %v3382_v37 = vadd.f32 %v1686_v54, %v1278_v8  ;;  %v4023_v0 = vld [vmem:[%s4322_s17] ss:$0 sm:$0xff] }
 0x2a8   : > { %v1741_v21 = vadd.f32 %v3381_v41, %v3967_v51 }
 0x2a9   : > { %v1740_v45 = vadd.f32 %v3382_v37, %v3967_v51  ;;  %v3186_v63 = vpop.f32.mrb[14].mxu0  ;;  %3210 = vmatprep.mubr.msk.f32.mxu1 %vm1771_vm8, %v1754_v20 }
 0x2aa   : > { %v3383_v36 = vadd.f32 %v3186_v63, %v3132_v49  ;;  %v1696_v46 = vpop.f32.mrb[15].mxu0  ;;  %3211 = vmatmul.mubr.msk.f32.gmra.mrb[16].mxu1 %vm1771_vm8, %v1755_v33  ;;  %v1757_v27 = vmax.f32 %v1741_v21, 0.0  ;;  %v1966_v49 = vshrl.u32 %v905_v48, 7  ;;  %v4018_v48 = vld [vmem:[%s4316_s11] ss:$0 sm:$0xff] }
 0x2ab   : > { %v1756_v4 = vmax.f32 %v1740_v45, 0.0  ;;  %v3384_v7 = vadd.f32 %v1696_v46, %v1288_v42  ;;  %v4007_v42 = vld [vmem:[%s724_s6] ss:$0 sm:$0xff] }
 0x2ac   : > { %v1743_v3 = vadd.f32 %v3383_v36, %v3967_v51  ;;  %v4009_v55 = vadd.s32 8, %v1966_v49  ;;  %vm1973_vm9 = vcmp.eq.s32.totalorder %v1966_v49, %v4007_v42 }
 0x2ad   : > { %v1742_v8 = vadd.f32 %v3384_v7, %v3967_v51  ;;  %3213 = vmatprep.mubr.msk.f32.mxu1 %vm1771_vm8, %v1756_v4  ;;  %v3477_v51 = vmov 1.0  }
 0x2ae   : > { %3214 = vmatmul.mubr.msk.f32.gmra.mrb[18].mxu1 %vm1771_vm8, %v1757_v27  ;;  %v1759_v26 = vmax.f32 %v1743_v3, 0.0  ;;  %vm1974_vm10 = vcmp.eq.s32.totalorder %v4009_v55, %v4007_v42 }
 0x2af   : > { %v1758_v37 = vmax.f32 %v1742_v8, 0.0 }
 0x2b1   : > { %3216 = vmatprep.mubr.msk.f32.mxu1 %vm1771_vm8, %v1758_v37 }
 0x2b2   : > { %3217 = vmatmul.mubr.msk.f32.gmra.mrb[20].mxu1 %vm1771_vm8, %v1759_v26 }
 0x2b3   : > { %3251 = vmatprep.mubr.msk.f32.mxu1 %vm1973_vm9, %v3477_v51 }
 0x367   : > { %v3197_v52 = vpop.f32.mrb[6].mxu1 }
 0x368   : > { %v1892_v32 = vadd.f32 %v3197_v52, %v4018_v48  ;;  %v1886_v41 = vpop.f32.mrb[7].mxu1 }
 0x369   : > { %v1887_v54 = vadd.f32 %v4018_v48, %v1886_v41 }
 0x36a   : > { %v2066_v20 = vmul.f32 %v4023_v0, %v1892_v32 }
 0x36b   : > { %v3325_v33 = vpack.c.bf16 %v1892_v32, %v1887_v54  ;;  %v3200_v21 = vpop.f32.mrb[8].mxu1  ;;  %v2065_v45 = vmul.f32 %v4023_v0, %v1887_v54 }
 0x36c   : > { %v1902_v63 = vadd.f32 %v3200_v21, %v4018_v48  ;;  %v1896_v36 = vpop.f32.mrb[9].mxu1  ;;  %v2084_v46 = vsel %vm1771_vm8, %v2066_v20, 0.0 }
 0x36d   : > { %v1897_v4 = vadd.f32 %v4018_v48, %v1896_v36  ;;  %2085 = vadd.xlane.f32.xlu1 %v2084_v46  ;;  %3326 = vmatprep.subr.bf16.mxu1 %v3325_v33  ;;  %v2081_v7 = vsel %vm1771_vm8, %v2065_v45, 0.0 }
 0x36e   : > { %2082 = vadd.xlane.f32.xlu0 %v2081_v7  ;;  %3328 = vmatpush3.bf16.msra.mxu1 %v3325_v33  ;;  %v2068_v32 = vmul.f32 %v4023_v0, %v1902_v63 }
 0x36f   : > { %v3329_v27 = vpack.c.bf16 %v1902_v63, %v1897_v4  ;;  %v3203_v3 = vpop.f32.mrb[10].mxu1  ;;  %v2067_v8 = vmul.f32 %v4023_v0, %v1897_v4 }
 0x370   : > { %v1912_v37 = vadd.f32 %v3203_v3, %v4018_v48  ;;  %v1906_v26 = vpop.f32.mrb[11].mxu1  ;;  %v2090_v36 = vsel %vm1771_vm8, %v2068_v32, 0.0 }
 0x371   : > { %v1907_v49 = vadd.f32 %v4018_v48, %v1906_v26  ;;  %3330 = vmatprep.subr.bf16.mxu1 %v3329_v27  ;;  %v2087_v52 = vsel %vm1771_vm8, %v2067_v8, 0.0 }
 0x372   : > { %2088 = vadd.xlane.f32.xlu0 %v2087_v52  ;;  %3332 = vmatpush3.bf16.msra.mxu1 %v3329_v27  ;;  %v2070_v4 = vmul.f32 %v4023_v0, %v1912_v37 }
 0x373   : > { %v3333_v41 = vpack.c.bf16 %v1912_v37, %v1907_v49  ;;  %v3206_v54 = vpop.f32.mrb[12].mxu1  ;;  %v2069_v20 = vmul.f32 %v4023_v0, %v1907_v49 }
 0x374   : > { %v1922_v33 = vadd.f32 %v3206_v54, %v4018_v48  ;;  %v1916_v21 = vpop.f32.mrb[13].mxu1  ;;  %v2096_v49 = vsel %vm1771_vm8, %v2070_v4, 0.0 }
 0x375   : > { %v1917_v45 = vadd.f32 %v4018_v48, %v1916_v21  ;;  %3334 = vmatprep.subr.bf16.mxu1 %v3333_v41  ;;  %v2093_v46 = vsel %vm1771_vm8, %v2069_v20, 0.0 }
 0x376   : > { %2091 = vadd.xlane.f32.xlu0 %v2090_v36  ;;  %2094 = vadd.xlane.f32.xlu1 %v2093_v46  ;;  %v2072_v32 = vmul.f32 %v4023_v0, %v1922_v33 }
 0x377   : > { %v3337_v63 = vpack.c.bf16 %v1922_v33, %v1917_v45  ;;  %3336 = vmatpush3.bf16.msra.mxu1 %v3333_v41  ;;  %v3209_v7 = vpop.f32.mrb[14].mxu1  ;;  %v2071_v27 = vmul.f32 %v4023_v0, %v1917_v45 }
 0x378   : > { %v1932_v3 = vadd.f32 %v3209_v7, %v4018_v48  ;;  %v1926_v8 = vpop.f32.mrb[15].mxu1  ;;  %v2102_v20 = vsel %vm1771_vm8, %v2072_v32, 0.0 }
 0x379   : > { %v1927_v26 = vadd.f32 %v4018_v48, %v1926_v8  ;;  %3338 = vmatprep.subr.bf16.mxu1 %v3337_v63  ;;  %v2099_v52 = vsel %vm1771_vm8, %v2071_v27, 0.0 }
 0x37a   : > { %2097 = vadd.xlane.f32.xlu0 %v2096_v49  ;;  %2100 = vadd.xlane.f32.xlu1 %v2099_v52  ;;  %v2074_v45 = vmul.f32 %v4023_v0, %v1932_v3 }
 0x37b   : > { %v3341_v37 = vpack.c.bf16 %v1932_v3, %v1927_v26  ;;  %3340 = vmatpush3.bf16.msra.mxu1 %v3337_v63  ;;  %v2073_v41 = vmul.f32 %v4023_v0, %v1927_v26 }
 0x37c   : > { %v2108_v7 = vsel %vm1771_vm8, %v2074_v45, 0.0  ;;  %v2216_v45 = vld [vmem:[%s4351_s29 + $0x8] sm:$0xff] }
 0x37d   : > { %v3212_v54 = vpop.f32.mrb[16].mxu1  ;;  %3342 = vmatprep.subr.bf16.mxu1 %v3341_v37  ;;  %v2105_v21 = vsel %vm1771_vm8, %v2073_v41, 0.0 }
 0x37e   : > { %v1942_v36 = vadd.f32 %v3212_v54, %v4018_v48  ;;  %2103 = vadd.xlane.f32.xlu0 %v2102_v20  ;;  %2106 = vadd.xlane.f32.xlu1 %v2105_v21  ;;  %v1936_v46 = vpop.f32.mrb[17].mxu1  ;;  %v2215_v21 = vld [vmem:[%s4351_s29] sm:$0xff] }
 0x37f   : > { %v1937_v33 = vadd.f32 %v4018_v48, %v1936_v46  ;;  %3344 = vmatpush3.bf16.msra.mxu1 %v3341_v37 }
 0x380   : > { %v2076_v8 = vmul.f32 %v4023_v0, %v1942_v36 }
 0x381   : > { %v3345_v4 = vpack.c.bf16 %v1942_v36, %v1937_v33  ;;  %v3215_v63 = vpop.f32.mrb[18].mxu1  ;;  %v2075_v27 = vmul.f32 %v4023_v0, %v1937_v33 }
 0x382   : > { %v1952_v26 = vadd.f32 %v3215_v63, %v4018_v48  ;;  %2109 = vadd.xlane.f32.xlu0 %v2108_v7  ;;  %v1946_v3 = vpop.f32.mrb[19].mxu1  ;;  %v2114_v41 = vsel %vm1771_vm8, %v2076_v8, 0.0  ;;  %v3357_v63 = vpack.c.bf16 %v2216_v45, %v2215_v21 }
 0x383   : > { %v1947_v49 = vadd.f32 %v4018_v48, %v1946_v3  ;;  %3346 = vmatprep.subr.bf16.mxu1 %v3345_v4  ;;  %v2111_v52 = vsel %vm1771_vm8, %v2075_v27, 0.0 }
 0x384   : > { %2112 = vadd.xlane.f32.xlu1 %v2111_v52  ;;  %3348 = vmatpush3.bf16.msra.mxu1 %v3345_v4  ;;  %v2078_v20 = vmul.f32 %v4023_v0, %v1952_v26 }
 0x385   : > { %v3349_v32 = vpack.c.bf16 %v1952_v26, %v1947_v49  ;;  %v3218_v37 = vpop.f32.mrb[20].mxu1  ;;  %v2077_v54 = vmul.f32 %v4023_v0, %v1947_v49 }
 0x386   : > { %v1962_v36 = vadd.f32 %v3218_v37, %v4018_v48  ;;  %2115 = vadd.xlane.f32.xlu0 %v2114_v41  ;;  %v1956_v46 = vpop.f32.mrb[21].mxu1  ;;  %v2120_v27 = vsel %vm1771_vm8, %v2078_v20, 0.0 }
 0x387   : > { %v1957_v33 = vadd.f32 %v4018_v48, %v1956_v46  ;;  %3350 = vmatprep.subr.bf16.mxu1 %v3349_v32  ;;  %v2117_v4 = vsel %vm1771_vm8, %v2077_v54, 0.0 }
 0x388   : > { %2118 = vadd.xlane.f32.xlu1 %v2117_v4  ;;  %3352 = vmatpush3.bf16.msra.mxu1 %v3349_v32  ;;  %v2080_v26 = vmul.f32 %v4023_v0, %v1962_v36 }
 0x389   : > { %v3353_v7 = vpack.c.bf16 %v1962_v36, %v1957_v33  ;;  %v2079_v8 = vmul.f32 %v4023_v0, %v1957_v33 }
 0x38a   : > { %2121 = vadd.xlane.f32.xlu0 %v2120_v27  ;;  %v2126_v48 = vsel %vm1771_vm8, %v2080_v26, 0.0 }
 0x38b   : > { %3354 = vmatprep.subr.bf16.mxu1 %v3353_v7  ;;  %v2123_v3 = vsel %vm1771_vm8, %v2079_v8, 0.0 }
 0x38c   : > { %2124 = vadd.xlane.f32.xlu1 %v2123_v3  ;;  %3356 = vmatpush3.bf16.msra.mxu1 %v3353_v7 }
 0x38d   : > { %3358 = vmatprep.subr.bf16.mxu1 %v3357_v63 }
 0x38e   : > { %2127 = vadd.xlane.f32.xlu0 %v2126_v48 }
 0x38f   : > { %3252 = vmatmul.mubr.msk.f32.vlgmr.msra.gmra.mrb[22].mxu1 %vm1974_vm10, %v3477_v51 }
 0x390   : > { %3360 = vmatpush3.bf16.msra.mxu1 %v3357_v63  ;;  %3258 = vmatprep.mubr.msk.f32.mxu1 %vm1103_vm3, %v2199_v13  ;;  %v4147_v13 = vstv %s2129_s0 }
 0x393   : > { %3259 = vmatmul.mubr.msk.f32.vlgmr.msra.gmra.mrb[24].mxu1 %vm1103_vm3, %v2200_v12 }
 0x394   : > { %3261 = vmatprep.mubr.msk.f32.mxu1 %vm1103_vm3, %v2201_v19 }
 0x397   : > { %3262 = vmatmul.mubr.msk.f32.gmra.mrb[26].mxu1 %vm1103_vm3, %v2202_v18 }
 0x398   : > { %3264 = vmatprep.mubr.msk.f32.mxu1 %vm1103_vm3, %v2203_v25  ;;  %v4152_v25 = vstv %s2163_s1  ;;  %s4362_s1 = sld [smem:[#allocation20_spill]] (!%p2951_p6) }
 0x39b   : > { %3265 = vmatmul.mubr.msk.f32.gmra.mrb[28].mxu1 %vm1103_vm3, %v2204_v24 }
 0x39c   : > { %3267 = vmatprep.mubr.msk.f32.mxu1 %vm1103_vm3, %v2205_v31  ;;  %v1978_v31 = vld [vmem:[#allocation4 + $0x8] sm:$0xff] }
 0x39f   : > { %3268 = vmatmul.mubr.msk.f32.gmra.mrb[30].mxu1 %vm1103_vm3, %v2206_v30 }
 0x3a0   : > { %3270 = vmatprep.mubr.msk.f32.mxu1 %vm1103_vm3, %v4352_v53 }
 0x3a3   : > { %3271 = vmatmul.mubr.msk.f32.gmra.mrb[32].mxu1 %vm1103_vm3, %v4353_v56 }
 0x3a4   : > { %3273 = vmatprep.mubr.msk.f32.mxu1 %vm1103_vm3, %v4354_v57 }
 0x3a7   : > { %3274 = vmatmul.mubr.msk.f32.gmra.mrb[34].mxu1 %vm1103_vm3, %v4355_v61 }
 0x3a8   : > { %3276 = vmatprep.mubr.msk.f32.mxu1 %vm1103_vm3, %v4356_v62 }
 0x3ab   : > { %3277 = vmatmul.mubr.msk.f32.gmra.mrb[36].mxu1 %vm1103_vm3, %v4357_v1 }
 0x3ac   : > { %3279 = vmatprep.mubr.msk.f32.mxu1 %vm1103_vm3, %v4358_v2 }
 0x3af   : > { %3280 = vmatmul.mubr.msk.f32.gmra.mrb[38].mxu1 %vm1103_vm3, %v4359_v5  ;;  %vm2427_vm3 = vcmask 23552  }
 0x3fa   : > { %v2086_v11 = vpop.xlane.xlu1 %2085 }
 0x3fb   : > { %v2083_v6 = vpop.xlane.xlu0 %2082  ;;  %v2132_v17 = vadd.f32 %v4147_v13, %v2086_v11 }
 0x3fc   : > { %v2131_v18 = vadd.f32 %v4147_v13, %v2083_v6 }
 0x3fd   : > { %v2148_v24 = vmax.f32 %v2132_v17, 0.0 }
 0x3fe   : > { %v2147_v28 = vmax.f32 %v2131_v18, 0.0 }
 0x3ff   : > { %v2089_v9 = vpop.xlane.xlu0 %2088  ;;  %v2166_v34 = vmul.f32 %v4152_v25, %v2148_v24 }
 0x400   : > { %v2133_v22 = vadd.f32 %v4147_v13, %v2089_v9  ;;  %v2165_v44 = vmul.f32 %v4152_v25, %v2147_v28 }
 0x401   : > { %v2184_v51 = vadd.f32 %v4159_v60, %v2166_v34 }
 0x402   : > { %v2149_v30 = vmax.f32 %v2133_v22, 0.0  ;;  %v2183_v41 = vadd.f32 %v4159_v60, %v2165_v44 }
 0x403   : > { %v2092_v10 = vpop.xlane.xlu0 %2091  ;;  %v2095_v16 = vpop.xlane.xlu1 %2094 }
 0x404   : > { %v2134_v29 = vadd.f32 %v4147_v13, %v2092_v10  ;;  %v2135_v35 = vadd.f32 %v4147_v13, %v2095_v16  ;;  %v2167_v38 = vmul.f32 %v4152_v25, %v2149_v30 }
 0x406   : > { %v2150_v47 = vmax.f32 %v2134_v29, 0.0  ;;  %v2151_v42 = vmax.f32 %v2135_v35, 0.0  ;;  %v2185_v46 = vadd.f32 %v4159_v60, %v2167_v38 }
 0x407   : > { %v2098_v12 = vpop.xlane.xlu0 %2097  ;;  %v2101_v23 = vpop.xlane.xlu1 %2100 }
 0x408   : > { %v2136_v50 = vadd.f32 %v4147_v13, %v2098_v12  ;;  %v2137_v55 = vadd.f32 %v4147_v13, %v2101_v23  ;;  %v2168_v0 = vmul.f32 %v4152_v25, %v2150_v47  ;;  %v2169_v33 = vmul.f32 %v4152_v25, %v2151_v42 }
 0x40a   : > { %v2152_v49 = vmax.f32 %v2136_v50, 0.0  ;;  %v2153_v4 = vmax.f32 %v2137_v55, 0.0  ;;  %v2186_v3 = vadd.f32 %v4159_v60, %v2168_v0  ;;  %v2187_v10 = vadd.f32 %v4159_v60, %v2169_v33 }
 0x40b   : > { %v2104_v19 = vpop.xlane.xlu0 %2103  ;;  %v2107_v58 = vpop.xlane.xlu1 %2106 }
 0x40c   : > { %v2138_v52 = vadd.f32 %v4147_v13, %v2104_v19  ;;  %v2139_v54 = vadd.f32 %v4147_v13, %v2107_v58  ;;  %v2170_v27 = vmul.f32 %v4152_v25, %v2152_v49  ;;  %v2171_v11 = vmul.f32 %v4152_v25, %v2153_v4 }
 0x40e   : > { %v2154_v8 = vmax.f32 %v2138_v52, 0.0  ;;  %v2155_v53 = vmax.f32 %v2139_v54, 0.0  ;;  %v2188_v17 = vadd.f32 %v4159_v60, %v2170_v27 }
 0x40f   : > { %v2110_v40 = vpop.xlane.xlu0 %2109 }
 0x410   : > { %v2140_v63 = vadd.f32 %v4147_v13, %v2110_v40  ;;  %v2172_v12 = vmul.f32 %v4152_v25, %v2154_v8  ;;  %v2173_v19 = vmul.f32 %v4152_v25, %v2155_v53 }
 0x411   : > { %v2113_v32 = vpop.xlane.xlu1 %2112 }
 0x412   : > { %v2141_v61 = vadd.f32 %v4147_v13, %v2113_v32  ;;  %v2156_v5 = vmax.f32 %v2140_v63, 0.0  ;;  %v2190_v50 = vadd.f32 %v4159_v60, %v2172_v12 }
 0x413   : > { %v2116_v20 = vpop.xlane.xlu0 %2115 }
 0x414   : > { %v2142_v6 = vadd.f32 %v4147_v13, %v2116_v20  ;;  %v2157_v24 = vmax.f32 %v2141_v61, 0.0 }
 0x415   : > { %v2119_v62 = vpop.xlane.xlu1 %2118 }
 0x416   : > { %v2158_v34 = vmax.f32 %v2142_v6, 0.0  ;;  %v2143_v35 = vadd.f32 %v4147_v13, %v2119_v62  ;;  %v2175_v42 = vmul.f32 %v4152_v25, %v2157_v24 }
 0x417   : > { %v2122_v9 = vpop.xlane.xlu0 %2121 }
 0x418   : > { %v2176_v49 = vmul.f32 %v4152_v25, %v2158_v34  ;;  %v2159_v52 = vmax.f32 %v2143_v35, 0.0 }
 0x419   : > { %v2125_v44 = vpop.xlane.xlu1 %2124 }
 0x41a   : > { %v2145_v54 = vadd.f32 %v4147_v13, %v2125_v44  ;;  %v2194_v8 = vadd.f32 %v4159_v60, %v2176_v49  ;;  %v2478_v49 = vld [vmem:[%s4318_s13 + $0x8] sm:$0xff] (!%p2951_p6) }
 0x462   : > { %v3253_v59 = vpop.f32.mrb[22].mxu1 }
 0x463   : > { %v2055_v14 = vadd.f32 %v3253_v59, %v1978_v31  ;;  %v2045_v15 = vpop.f32.mrb[23].mxu1  ;;  %v2174_v31 = vmul.f32 %v4152_v25, %v2156_v5  ;;  %v2189_v59 = vadd.f32 %v4159_v60, %v2171_v11 }
 0x464   : > { %v2054_v39 = vadd.f32 %v2045_v15, %v1977_v43  ;;  %v2144_v43 = vadd.f32 %v4147_v13, %v2122_v9 }
 0x465   : > { %2057 = vst.msk [vmem:[#allocation4 + $0x8] sm:$0xff] %vm1771_vm8, %v2055_v14  ;;  %v2128_v14 = vpop.xlane.xlu0 %2127 }
 0x466   : > { %2056 = vst.msk [vmem:[#allocation4] sm:$0xff] %vm1771_vm8, %v2054_v39  ;;  %v3260_v37 = vpop.f32.mrb[24].mxu1  ;;  %v2191_v39 = vadd.f32 %v4159_v60, %v2173_v19  ;;  %v2146_v20 = vadd.f32 %v4147_v13, %v2128_v14 }
 0x467   : > { %v2412_v21 = vmul.f32 %v3260_v37, %v2184_v51  ;;  %v2331_v45 = vpop.f32.mrb[25].mxu1  ;;  %v2192_v37 = vadd.f32 %v4159_v60, %v2174_v31 }
 0x468   : > { %v2411_v36 = vmul.f32 %v2331_v45, %v2183_v41  ;;  %v2160_v41 = vmax.f32 %v2144_v43, 0.0  ;;  %v2162_v13 = vmax.f32 %v2146_v20, 0.0 }
 0x469   : > { %v2429_v7 = vsel %vm2427_vm3, %v2412_v21, 0.0 }
 0x46a   : > { %v2428_v26 = vsel %vm2427_vm3, %v2411_v36, 0.0  ;;  %v3263_v48 = vpop.f32.mrb[26].mxu1 }
 0x46b   : > { %v2430_v56 = vadd.f32 %v2429_v7, %v2428_v26  ;;  %v2341_v57 = vpop.f32.mrb[27].mxu1  ;;  %v2414_v1 = vmul.f32 %v3263_v48, %v2186_v3  ;;  %v2177_v7 = vmul.f32 %v4152_v25, %v2159_v52  ;;  %v2193_v26 = vadd.f32 %v4159_v60, %v2175_v42  ;;  %v2479_v52 = vld [vmem:[%s4318_s13 + $0x10] sm:$0xff] (!%p2951_p6) }
 0x46c   : > { %v2413_v2 = vmul.f32 %v2341_v57, %v2185_v46  ;;  %v2178_v3 = vmul.f32 %v4152_v25, %v2160_v41  ;;  %v2161_v48 = vmax.f32 %v2145_v54, 0.0  ;;  %v2474_v41 = vld [vmem:[%s4317_s12] sm:$0xff] (!%p2951_p6) }
 0x46d   : > { %v2433_v28 = vsel %vm2427_vm3, %v2414_v1, 0.0  ;;  %v2195_v6 = vadd.f32 %v4159_v60, %v2177_v7  ;;  %v2472_v54 = vld [vmem:[%s4360_s3] sm:$0xff] (!%p2951_p6)  ;;  %3293 = vmatprep.subr.mxu1 (!%p2951_p6), %v2474_v41  ;;  %v2658_v7 = vld [vmem:[%s4320_s15 + $0x18] sm:$0xff] (!%p2951_p6) }
 0x46e   : > { %v2431_v16 = vsel %vm2427_vm3, %v2413_v2, 0.0  ;;  %v3266_v18 = vpop.f32.mrb[28].mxu1  ;;  %v2179_v9 = vmul.f32 %v4152_v25, %v2161_v48  ;;  %v2196_v12 = vadd.f32 %v4159_v60, %v2178_v3  ;;  %3295 = vmatprep.mubr.msk.f32.mxu1 (!%p2951_p6), %vm2562_vm12, %v2472_v54  ;;  %3294 = vmatpush3.msra.mxu1 (!%p2951_p6), %v2474_v41  ;;  %v2956_v48 = vld [vmem:[%s4319_s14] ss:$0 sm:$0xff] (!%p2951_p6) }
 0x46f   : > { %v2432_v22 = vadd.f32 %v2431_v16, %v2430_v56  ;;  %v2351_v23 = vpop.f32.mrb[29].mxu1  ;;  %v2416_v29 = vmul.f32 %v3266_v18, %v2188_v17 }
 0x470   : > { %v2415_v30 = vmul.f32 %v2351_v23, %v2187_v10  ;;  %v2180_v10 = vmul.f32 %v4152_v25, %v2162_v13  ;;  %v2197_v31 = vadd.f32 %v4159_v60, %v2179_v9 }
 0x471   : > { %v2434_v40 = vadd.f32 %v2433_v28, %v2432_v22  ;;  %v2437_v55 = vsel %vm2427_vm3, %v2416_v29, 0.0 }
 0x472   : > { %v2435_v47 = vsel %vm2427_vm3, %v2415_v30, 0.0  ;;  %v3269_v58 = vpop.f32.mrb[30].mxu1  ;;  %v2198_v29 = vadd.f32 %v4159_v60, %v2180_v10 }
 0x473   : > { %v2436_v15 = vadd.f32 %v2435_v47, %v2434_v40  ;;  %v2361_v38 = vpop.f32.mrb[31].mxu1  ;;  %v2418_v51 = vmul.f32 %v3269_v58, %v2190_v50 }
 0x474   : > { %v2417_v0 = vmul.f32 %v2361_v38, %v2189_v59 }
 0x475   : > { %v2438_v32 = vadd.f32 %v2437_v55, %v2436_v15  ;;  %v2441_v33 = vsel %vm2427_vm3, %v2418_v51, 0.0  ;;  %v2410_v55 = vld [vmem:[#allocation5] sm:$0x1] }
 0x476   : > { %v2439_v21 = vsel %vm2427_vm3, %v2417_v0, 0.0  ;;  %v3272_v45 = vpop.f32.mrb[32].mxu1  ;;  %v2477_v0 = vld [vmem:[%s4318_s13] sm:$0xff] (!%p2951_p6) }
 0x477   : > { %v2440_v36 = vadd.f32 %v2439_v21, %v2438_v32  ;;  %v2371_v46 = vpop.f32.mrb[33].mxu1  ;;  %v2420_v4 = vmul.f32 %v3272_v45, %v2192_v37  ;;  %v3361_v32 = vpack.c.bf16 (!%p2951_p6), %v2478_v49, %v2477_v0  ;;  %v2480_v37 = vld [vmem:[%s4318_s13 + $0x18] sm:$0xff] (!%p2951_p6)  ;;  %v2475_v21 = vld [vmem:[#allocation4] sm:$0xff] (!%p2951_p6)  ;;  %v2473_v45 = vld [vmem:[%s4360_s3 + $0x8] sm:$0xff] (!%p2951_p6) }
 0x478   : > { %v2419_v63 = vmul.f32 %v2371_v46, %v2191_v39  ;;  %v3365_v20 = vpack.c.bf16 (!%p2951_p6), %v2480_v37, %v2479_v52  ;;  %3290 = vmatprep.mubr.msk.f32.mxu0 (!%p2951_p6), %vm1771_vm8, %v2475_v21  ;;  %3296 = vmatmul.mubr.msk.f32.vlgmr.msra.gmra.mrb[0].mxu1 (!%p2951_p6), %vm2562_vm12, %v2473_v45  ;;  %v2655_v46 = vld [vmem:[%s4320_s15] sm:$0xff] (!%p2951_p6) }
 0x479   : > { %v2442_v27 = vadd.f32 %v2441_v33, %v2440_v36  ;;  %v2445_v62 = vsel %vm2427_vm3, %v2420_v4, 0.0  ;;  %3362 = vmatprep.subr.bf16.mxu0 (!%p2951_p6), %v3361_v32  ;;  %v2476_v36 = vld [vmem:[#allocation4 + $0x8] sm:$0xff] (!%p2951_p6) }
 0x47a   : > { %v2443_v53 = vsel %vm2427_vm3, %v2419_v63, 0.0  ;;  %v3275_v56 = vpop.f32.mrb[34].mxu1  ;;  %3364 = vmatpush3.bf16.msra.mxu0 (!%p2951_p6), %v3361_v32  ;;  %v2656_v33 = vld [vmem:[%s4320_s15 + $0x8] sm:$0xff] (!%p2951_p6)  ;;  %v2657_v63 = vld [vmem:[%s4320_s15 + $0x10] sm:$0xff] (!%p2951_p6) }
 0x47b   : > { %v2444_v57 = vadd.f32 %v2443_v53, %v2442_v27  ;;  %v2381_v61 = vpop.f32.mrb[35].mxu1  ;;  %v2422_v1 = vmul.f32 %v3275_v56, %v2194_v8  ;;  %3366 = vmatprep.subr.bf16.mxu0 (!%p2951_p6), %v3365_v20  ;;  %v3369_v4 = vpack.c.bf16 (!%p2951_p6), %v2656_v33, %v2655_v46  ;;  %v3373_v27 = vpack.c.bf16 (!%p2951_p6), %v2658_v7, %v2657_v63 }
 0x47c   : > { %v2421_v2 = vmul.f32 %v2381_v61, %v2193_v26 }
 0x47d   : > { %v2446_v5 = vadd.f32 %v2445_v62, %v2444_v57  ;;  %v2449_v19 = vsel %vm2427_vm3, %v2422_v1, 0.0  ;;  %3370 = vmatprep.subr.bf16.mxu1 (!%p2951_p6), %v3369_v4 }
 0x47e   : > { %v2447_v11 = vsel %vm2427_vm3, %v2421_v2, 0.0  ;;  %v3278_v16 = vpop.f32.mrb[36].mxu1  ;;  %3368 = vmatpush3.bf16.msra.mxu0 (!%p2951_p6), %v3365_v20  ;;  %3372 = vmatpush3.bf16.msra.mxu1 (!%p2951_p6), %v3369_v4  ;;  %v2749_v2 = vld [vmem:[%s4361_s23] sm:$0xff] (!%p2951_p6) }
 0x47f   : > { %v2448_v17 = vadd.f32 %v2447_v11, %v2446_v5  ;;  %v2391_v18 = vpop.f32.mrb[37].mxu1  ;;  %v2424_v22 = vmul.f32 %v3278_v16, %v2196_v12  ;;  %3374 = vmatprep.subr.bf16.mxu1 (!%p2951_p6), %v3373_v27  ;;  %v2750_v5 = vld [vmem:[%s4361_s23 + $0x8] sm:$0xff] (!%p2951_p6)  ;;  %v2957_v11 = vld [vmem:[%s4362_s1] ss:$0 sm:$0xff] (!%p2951_p6) }
 0x480   : > { %v2423_v23 = vmul.f32 %v2391_v18, %v2195_v6 }
 0x481   : > { %v2450_v24 = vadd.f32 %v2449_v19, %v2448_v17  ;;  %v2453_v35 = vsel %vm2427_vm3, %v2424_v22, 0.0  ;;  %3291 = vmatmul.mubr.msk.f32.vlgmr.msra.gmra.mrb[0].mxu0 (!%p2951_p6), %vm1771_vm8, %v2476_v36 }
 0x482   : > { %v2451_v28 = vsel %vm2427_vm3, %v2423_v23, 0.0  ;;  %v3281_v30 = vpop.f32.mrb[38].mxu1  ;;  %3376 = vmatpush3.bf16.msra.mxu1 (!%p2951_p6), %v3373_v27 }
 0x483   : > { %v2452_v25 = vadd.f32 %v2451_v28, %v2450_v24  ;;  %v2401_v34 = vpop.f32.mrb[39].mxu1  ;;  %v2426_v40 = vmul.f32 %v3281_v30, %v2198_v29 }
 0x484   : > { %v2425_v43 = vmul.f32 %v2401_v34, %v2197_v31 }
 0x485   : > { %v2454_v44 = vadd.f32 %v2453_v35, %v2452_v25  ;;  %v2457_v58 = vsel %vm2427_vm3, %v2426_v40, 0.0 }
 0x486   : > { %v2455_v47 = vsel %vm2427_vm3, %v2425_v43, 0.0 }
 0x487   : > { %v2456_v50 = vadd.f32 %v2455_v47, %v2454_v44 }
 0x489   : > { %v2458_v59 = vadd.f32 %v2457_v58, %v2456_v50 }
 0x48b   : > { %v2459_v14 = vrot.slane %v2458_v59, 4 }
 0x48d   : > { %v2460_v15 = vadd.f32 %v2459_v14, %v2458_v59 }
 0x48f   : > { %v2461_v38 = vrot.slane %v2460_v15, 2 }
 0x491   : > { %v2462_v39 = vadd.f32 %v2461_v38, %v2460_v15 }
 0x493   : > { %v2463_v42 = vrot.slane %v2462_v39, 1  ;;  %2471 = sbr.rel (%p2951_p6) target bundleno = 1589 (0x635), region = 112 }
 0x495   : > { %v2464_v60 = vadd.f32 %v2463_v42, %v2462_v39 }
 0x497   : > { %v2465_v51 = vadd.f32 %v2464_v60, %v2410_v55 }
 0x499   : > { %2467 = vst.msk [vmem:[#allocation5] sm:$0x1] %vm2466_vm11, %v2465_v51 }
 0x4a0   : > { %v2960_v6 = vld [vmem:[#allocation5] ss:$0 sm:$0xff] }
 0x4a1   : > { %v2758_v9 = vadd.f32 %v2960_v6, %v2749_v2  ;;  %v2759_v10 = vadd.f32 %v2960_v6, %v2750_v5 }
 0x4a3   : > { %2760 = vst.msk [vmem:[%s4327_s22] sm:$0xff] %vm2427_vm3, %v2758_v9  ;;  %2761 = vst.msk [vmem:[%s4327_s22 + $0x8] sm:$0xff] %vm2427_vm3, %v2759_v10 }
 0x54b   : > { %v3297_v8 = vpop.f32.mrb[0].mxu1 }
 0x54c   : > { %v2635_v26 = vpop.f32.mrb[1].mxu1 }
 0x554   : > { %v3292_v3 = vpop.f32.mrb[0].mxu0 }
 0x555   : > { %v2641_v13 = vadd.f32 %v3297_v8, %v3292_v3  ;;  %v2553_v53 = vpop.f32.mrb[1].mxu0 }
 0x556   : > { %v2636_v56 = vadd.f32 %v2635_v26, %v2553_v53 }
 0x557   : > { %v2652_v57 = vadd.f32 %v2956_v48, %v2641_v13 }
 0x558   : > { %v2651_v61 = vadd.f32 %v2956_v48, %v2636_v56 }
 0x559   : > { %v2654_v1 = vmax.f32 %v2652_v57, 0.0 }
 0x55a   : > { %v2653_v62 = vmax.f32 %v2651_v61, 0.0 }
 0x55c   : > { %3306 = vmatprep.mubr.msk.f32.mxu1 %vm1771_vm8, %v2653_v62 }
 0x55d   : > { %3307 = vmatmul.mubr.msk.f32.vlgmr.msra.gmra.mrb[2].mxu1 %vm1771_vm8, %v2654_v1 }
 0x630   : > { %v3308_v12 = vpop.f32.mrb[2].mxu1 }
 0x631   : > { %v2744_v16 = vadd.f32 %v3308_v12, %v2957_v11  ;;  %v2738_v17 = vpop.f32.mrb[3].mxu1 }
 0x632   : > { %v2739_v18 = vadd.f32 %v2957_v11, %v2738_v17 }
 0x633   : > { %2748 = vst.msk [vmem:[#allocation9 + $0x8] sm:$0xff] %vm1771_vm8, %v2744_v16 }
 0x634   : > { %2747 = vst.msk [vmem:[#allocation9] sm:$0xff] %vm1771_vm8, %v2739_v18 }
 0x635 PF: > { %p3417_p7 = scmp.eq.s32.totalorder %s3611_s18, 2  ;;  %s3478_s19 = smov [#allocation9]  }
 0x636   : > { %s2768_s5 = sshll.u32 %s3478_s19, 4  ;;  %s2769_s5 = int_to_ptr.vmem [resolvable:$true] %s2768_s5 }
 0x637   : > { %s3436_s24 = scalar_lea.vmem %s2769_s5, 256  ;;  %p3443_p11 = scmp.lt.s32.totalorder %s2769_s5, %s2769_s5 }
 0x638   : > { %p3437_p8 = scmp.ne.s32.totalorder %s2769_s5, %s3436_s24  ;;  %p3444_p12 = scmp.lt.s32.totalorder %s3436_s24, %s3436_s24 }
 0x63a   : > { %p3438_p9 = pnand %p3437_p8, %p3417_p7  ;;  %p3445_p13 = por %p3444_p12, %p3443_p11 }
 0x63c   : > { %p3439_p10 = pneg %p3438_p9 }
 0x63e   : > { %p3446_p0 = pnand %p3445_p13, %p3439_p10 }
 0x640   : > { %3449 = shalt.err (!%p3446_p0)
}
 0x641   : > { %s4363_s2 = sld [smem:[#allocation21_spill]] }
 0x647   : > { %s3450_s27 = scalar_lea.hbm %s4363_s2, 256 }
 0x648   : > { %p3451_p1 = scmp.ne.s32.totalorder %s4363_s2, %s3450_s27  ;;  %p3456_p4 = scmp.lt.u32.totalorder %s3450_s27, %s4363_s2 }
 0x64a   : > { %p3452_p2 = pnand %p3451_p1, %p3417_p7 }
 0x64c   : > { %p3453_p3 = pneg %p3452_p2 }
 0x64e   : > { %p3458_p5 = pnand %p3456_p4, %p3453_p3 }
 0x650   : > { %3461 = shalt.err (!%p3458_p5)
}
 0x651   : > { %s3479_s20 = smov 128   ;;  %s3480_s6 = smov 8  }
 0x652   : > { %3414 = dma.vmem_to_hbm [thread:$0]  (%p3417_p7), %s2769_s5, 256, %s4363_s2, [#allocation10], %s3479_s20, %s3479_s20, %s3480_s6  }
 0x653   : > { %3467 = dma.done.wait (%p3417_p7), [#allocation10], 256  }
 0x654   : > { %3469 = vsyncadd (%p3417_p7), [#allocation10], 4294967040 }
 0x655 PF: > { %s4364_s30 = sld [smem:[#allocation12_spill]] }
 0x65b   : > { %s37_s23 = sadd.s32 1, %s4364_s30  }
 0x65c   : > { %p34_p6 = scmp.ge.s32.totalorder %s37_s23, 5  }
 0x65e   :  { %36 = sbr.rel (!%p34_p6) target bundleno = 14 (0xe), region = 156 }
 0x665   :  { %2790 = vsyncpa [#allocation10], 1 }
 0x666   :  { %2792 = vsyncpa [#allocation10 + $0x1], 1 }

</bundles_post_ra>
